<compile_context>
chip_gen: v7x
topology: tpu7x:2x2x1
jax: 0.10.0
libtpu: 0.0.40
codegen_flags: <defaults>
</compile_context>

<pallas_src>
import jax
import jax.numpy as jnp
from jax.experimental import pallas as pl
from jax.experimental.pallas import tpu as pltpu

_LANE = 128


def _round_up(x, m):
    return ((x + m - 1) // m) * m


def _nn2_kernel(x_ref, w1_ref, b1_ref, w2_ref, b2_ref, out_ref):
    # fc1: (tb, Din) @ (Din, Hp) -> (tb, Hp); f32 accumulation on the MXU.
    h = jnp.dot(x_ref[...], w1_ref[...], preferred_element_type=jnp.float32)
    # Bias + ReLU in f32 on the VPU (padded hidden lanes stay exactly 0).
    h = jnp.maximum(h + b1_ref[...], 0.0)
    # fc2: (tb, Hp) @ (Hp, Doutp) -> (tb, Doutp); f32 accumulation.
    o = jnp.dot(h.astype(w2_ref.dtype), w2_ref[...],
                preferred_element_type=jnp.float32)
    out_ref[...] = (o + b2_ref[...]).astype(out_ref.dtype)


def _build_call(B, dim_in, hidden_p, dout_p, tb, out_dtype,
                vmem_limit_bytes, single_buffer_weights):
    const_kwargs = {}
    if single_buffer_weights:
        # Weights / biases never change across the batch grid; one VMEM buffer
        # is enough (default pipelining would allocate two copies each).
        const_kwargs = dict(pipeline_mode=pl.Buffered(1))

    grid_spec = pltpu.PrefetchScalarGridSpec(
        num_scalar_prefetch=0,
        grid=(pl.cdiv(B, tb),),
        in_specs=[
            pl.BlockSpec((tb, dim_in), lambda i: (i, 0)),                        # x tile
            pl.BlockSpec((dim_in, hidden_p), lambda i: (0, 0), **const_kwargs),  # w1^T
            pl.BlockSpec((1, hidden_p), lambda i: (0, 0), **const_kwargs),       # b1
            pl.BlockSpec((hidden_p, dout_p), lambda i: (0, 0), **const_kwargs),  # w2^T
            pl.BlockSpec((1, dout_p), lambda i: (0, 0), **const_kwargs),         # b2
        ],
        out_specs=pl.BlockSpec((tb, dout_p), lambda i: (i, 0)),
    )
    return pl.pallas_call(
        _nn2_kernel,
        out_shape=jax.ShapeDtypeStruct((B, dout_p), out_dtype),
        grid_spec=grid_spec,
        compiler_params=pltpu.CompilerParams(
            dimension_semantics=("parallel",),
            vmem_limit_bytes=vmem_limit_bytes,
        ),
    )


def nn2_forward(x, w1, b1, w2, b2, *, block_b=512, use_bf16=False):
    """Fused NN2 forward.  x: (B, ...); w1: (H, Din); b1: (H,); w2: (Dout, H)."""
    B = x.shape[0]
    x2 = x.reshape(B, -1)                    # x.view(B, -1)
    dim_in = x2.shape[1]
    hidden = w1.shape[0]
    dim_out = w2.shape[0]
    out_dtype = x2.dtype

    hidden_p = _round_up(hidden, _LANE)      # lane-dense fc1 activation / fc2 K
    dout_p = _round_up(dim_out, _LANE)       # lane-dense (unmasked) output stores

    # One-time wrapper-side transpose + zero-pad of the small, resident weights.
    # Exact through ReLU; amortized since the weight blocks are grid-invariant.
    w1t = jnp.pad(w1.T, ((0, 0), (0, hidden_p - hidden)))
    b1p = jnp.pad(b1, (0, hidden_p - hidden)).reshape(1, hidden_p).astype(jnp.float32)
    w2t = jnp.pad(w2.T, ((0, hidden_p - hidden), (0, dout_p - dim_out)))
    b2p = jnp.pad(b2, (0, dout_p - dim_out)).reshape(1, dout_p).astype(jnp.float32)

    cdt = jnp.bfloat16 if use_bf16 else x2.dtype
    xin = x2.astype(cdt)
    w1t = w1t.astype(cdt)
    w2t = w2t.astype(cdt)
    in_isz = jnp.dtype(cdt).itemsize
    out_isz = jnp.dtype(out_dtype).itemsize

    weight_bytes = ((dim_in * hidden_p + hidden_p * dout_p) * in_isz
                    + (hidden_p + dout_p) * 4)

    def tile_bytes(t):
        return (2 * t * dim_in * in_isz      # x (double-buffered)
                + 2 * t * dout_p * out_isz   # out (double-buffered)
                + t * hidden_p * 4           # fc1 activation (f32)
                + t * dout_p * 4)            # fc2 accumulator (f32)

    # Batch tile size: budget sized for the tightest generation (v7x: 64 MiB
    # VMEM per TensorCore; each core holds its own copy of the weights).
    budget = 40 * 1024 * 1024
    if B <= 16:
        tb = B                               # single tile (block == full dim)
    else:
        # >= 2 grid steps so the "parallel" axis can shard over v7x's 2 TCs;
        # tb is a multiple of 8 to satisfy the (8, 128) block constraint.
        tb = min(block_b, _round_up(pl.cdiv(B, 2), 8))
        while tb > 8 and 2 * weight_bytes + tile_bytes(tb) > budget:
            tb = max(8, _round_up(tb // 2, 8))

    need = 2 * weight_bytes + tile_bytes(tb)  # worst case: double-buffered weights
    vmem_limit_bytes = int(min(60 << 20, max(32 << 20, need + (8 << 20))))

    args = (xin, w1t, b1p, w2t, b2p)
    try:
        out = _build_call(B, dim_in, hidden_p, dout_p, tb, out_dtype,
                          vmem_limit_bytes, single_buffer_weights=True)(*args)
    except Exception:
        # Fallback for jax versions without pipeline_mode / Buffered(1):
        # identical kernel, default (double) buffering of the constant blocks.
        out = _build_call(B, dim_in, hidden_p, dout_p, tb, out_dtype,
                          vmem_limit_bytes, single_buffer_weights=False)(*args)

    # Strip the output lane padding (batch is not padded anymore).
    return out[:, :dim_out]


if __name__ == "__main__":
    # Module config: dim_in implied by flattened input, module_size = hidden.
    B, C, H, W = 2, 4, 16, 16              # x: (2, 4, 16, 16) -> dim_in = 1024
    dim_in = C * H * W
    hidden = 32                            # args.module_size
    dim_out = 16

    key = jax.random.PRNGKey(0)
    kx, k1, kb1, k2, kb2 = jax.random.split(key, 5)
    x = jax.random.normal(kx, (B, C, H, W), dtype=jnp.float32)
    # PyTorch nn.Linear weight layout: (out_features, in_features).
    w1 = jax.random.normal(k1, (hidden, dim_in), dtype=jnp.float32) * 0.02
    b1 = jax.random.normal(kb1, (hidden,), dtype=jnp.float32) * 0.02
    w2 = jax.random.normal(k2, (dim_out, hidden), dtype=jnp.float32) * 0.02
    b2 = jax.random.normal(kb2, (dim_out,), dtype=jnp.float32) * 0.02

    # --- default f32 path: matches the PyTorch module's math ----------------
    out = jax.block_until_ready(nn2_forward(x, w1, b1, w2, b2))
    x2 = x.reshape(B, -1)
    ref = jnp.maximum(x2 @ w1.T + b1, 0.0) @ w2.T + b2
    assert out.shape == (B, dim_out)
    assert jnp.allclose(out, ref, atol=1e-4, rtol=1e-4), "f32 path mismatch"

    # --- optional bf16 streaming path (f32 accumulation) ---------------------
    out16 = jax.block_until_ready(nn2_forward(x, w1, b1, w2, b2, use_bf16=True))
    hb = jnp.maximum(
        jnp.dot(x2.astype(jnp.bfloat16), w1.T.astype(jnp.bfloat16),
                preferred_element_type=jnp.float32) + b1, 0.0)
    ref16 = jnp.dot(hb.astype(jnp.bfloat16), w2.T.astype(jnp.bfloat16),
                    preferred_element_type=jnp.float32) + b2
    assert out16.shape == (B, dim_out)
    assert jnp.allclose(out16, ref16.astype(out16.dtype),
                        atol=2e-2, rtol=2e-2), "bf16 path mismatch"

    print("KERNEL_OK")
</pallas_src>

<mosaic_0001>
module attributes {stable_mosaic.version = 11 : i64} {
  func.func @_nn2_kernel(%arg0: i32, %arg1: memref<2x1024xf32, #tpu.memory_space<vmem>>, %arg2: memref<1024x128xf32, #tpu.memory_space<vmem>>, %arg3: memref<1x128xf32, #tpu.memory_space<vmem>>, %arg4: memref<128x128xf32, #tpu.memory_space<vmem>>, %arg5: memref<1x128xf32, #tpu.memory_space<vmem>>, %arg6: memref<2x128xf32, #tpu.memory_space<vmem>>) attributes {dimension_semantics = [#tpu.dimension_semantics<parallel>], iteration_bounds = array<i64: 1>, scalar_prefetch = 0 : i64, scratch_operands = 0 : i64, tpu.core_type = #tpu.core_type<tc>, window_params = [{transform_indices = @transform_0, window_bounds = array<i64: 2, 1024>}, {pipeline_mode = #tpu.pipeline_mode<synchronous>, transform_indices = @transform_1, window_bounds = array<i64: 1024, 128>}, {pipeline_mode = #tpu.pipeline_mode<synchronous>, transform_indices = @transform_2, window_bounds = array<i64: 1, 128>}, {pipeline_mode = #tpu.pipeline_mode<synchronous>, transform_indices = @transform_3, window_bounds = array<i64: 128, 128>}, {pipeline_mode = #tpu.pipeline_mode<synchronous>, transform_indices = @transform_4, window_bounds = array<i64: 1, 128>}, {transform_indices = @transform_5, window_bounds = array<i64: 2, 128>}]} {
    %c0 = arith.constant 0 : index
    %c0_0 = arith.constant 0 : index
    %0 = vector.load %arg1[%c0, %c0_0] : memref<2x1024xf32, #tpu.memory_space<vmem>>, vector<2x1024xf32>
    %c0_1 = arith.constant 0 : index
    %c0_2 = arith.constant 0 : index
    %1 = vector.load %arg2[%c0_1, %c0_2] : memref<1024x128xf32, #tpu.memory_space<vmem>>, vector<1024x128xf32>
    %cst = arith.constant dense<0.000000e+00> : vector<2x128xf32>
    %2 = tpu.matmul %0, %1, %cst {dimension_numbers = #tpu.dot_dimension_numbers<[1], [0], [0], [1], [0, 0, 1, 1], [], []>} : vector<2x1024xf32>, vector<1024x128xf32>, vector<2x128xf32> -> vector<2x128xf32>
    %c0_3 = arith.constant 0 : index
    %c0_4 = arith.constant 0 : index
    %3 = vector.load %arg3[%c0_3, %c0_4] : memref<1x128xf32, #tpu.memory_space<vmem>>, vector<1x128xf32>
    %4 = vector.broadcast %3 : vector<1x128xf32> to vector<2x128xf32>
    %5 = arith.addf %2, %4 : vector<2x128xf32>
    %cst_5 = arith.constant 0.000000e+00 : f32
    %6 = vector.broadcast %cst_5 : f32 to vector<2x128xf32>
    %7 = arith.maximumf %5, %6 : vector<2x128xf32>
    %c0_6 = arith.constant 0 : index
    %c0_7 = arith.constant 0 : index
    %8 = vector.load %arg4[%c0_6, %c0_7] : memref<128x128xf32, #tpu.memory_space<vmem>>, vector<128x128xf32>
    %cst_8 = arith.constant dense<0.000000e+00> : vector<2x128xf32>
    %9 = tpu.matmul %7, %8, %cst_8 {dimension_numbers = #tpu.dot_dimension_numbers<[1], [0], [0], [1], [0, 0, 1, 1], [], []>} : vector<2x128xf32>, vector<128x128xf32>, vector<2x128xf32> -> vector<2x128xf32>
    %c0_9 = arith.constant 0 : index
    %c0_10 = arith.constant 0 : index
    %10 = vector.load %arg5[%c0_9, %c0_10] : memref<1x128xf32, #tpu.memory_space<vmem>>, vector<1x128xf32>
    %11 = vector.broadcast %10 : vector<1x128xf32> to vector<2x128xf32>
    %12 = arith.addf %9, %11 : vector<2x128xf32>
    %c0_11 = arith.constant 0 : index
    %c0_12 = arith.constant 0 : index
    %13 = vector.load %arg6[%c0_11, %c0_12] : memref<2x128xf32, #tpu.memory_space<vmem>>, vector<2x128xf32>
    tpu.vector_store %arg6[%c0_11, %c0_12], %12 {strides = array<i32>} : memref<2x128xf32, #tpu.memory_space<vmem>>, vector<2x128xf32>,
    return
  }
  func.func @transform_0(%arg0: i32) -> (i32, i32) {
    %c0_i32 = arith.constant 0 : i32
    %c0_i32_0 = arith.constant 0 : i32
    return %arg0, %c0_i32 : i32, i32
  }
  func.func @transform_1(%arg0: i32) -> (i32, i32) {
    %c0_i32 = arith.constant 0 : i32
    %c0_i32_0 = arith.constant 0 : i32
    %c0_i32_1 = arith.constant 0 : i32
    return %c0_i32, %c0_i32_0 : i32, i32
  }
  func.func @transform_2(%arg0: i32) -> (i32, i32) {
    %c0_i32 = arith.constant 0 : i32
    %c0_i32_0 = arith.constant 0 : i32
    %c0_i32_1 = arith.constant 0 : i32
    return %c0_i32, %c0_i32_0 : i32, i32
  }
  func.func @transform_3(%arg0: i32) -> (i32, i32) {
    %c0_i32 = arith.constant 0 : i32
    %c0_i32_0 = arith.constant 0 : i32
    %c0_i32_1 = arith.constant 0 : i32
    return %c0_i32, %c0_i32_0 : i32, i32
  }
  func.func @transform_4(%arg0: i32) -> (i32, i32) {
    %c0_i32 = arith.constant 0 : i32
    %c0_i32_0 = arith.constant 0 : i32
    %c0_i32_1 = arith.constant 0 : i32
    return %c0_i32, %c0_i32_0 : i32, i32
  }
  func.func @transform_5(%arg0: i32) -> (i32, i32) {
    %c0_i32 = arith.constant 0 : i32
    %c0_i32_0 = arith.constant 0 : i32
    return %arg0, %c0_i32 : i32, i32
  }
}

module attributes {stable_mosaic.version = 11 : i64} {
  func.func @_nn2_kernel(%arg0: i32, %arg1: memref<2x1024xf32, #tpu.memory_space<vmem>>, %arg2: memref<1024x128xf32, #tpu.memory_space<vmem>>, %arg3: memref<1x128xf32, #tpu.memory_space<vmem>>, %arg4: memref<128x128xf32, #tpu.memory_space<vmem>>, %arg5: memref<1x128xf32, #tpu.memory_space<vmem>>, %arg6: memref<2x128xf32, #tpu.memory_space<vmem>>) attributes {dimension_semantics = [#tpu.dimension_semantics<parallel>], iteration_bounds = array<i64: 1>, scalar_prefetch = 0 : i64, scratch_operands = 0 : i64, tpu.core_type = #tpu.core_type<tc>, window_params = [{transform_indices = @transform_0, window_bounds = array<i64: 2, 1024>}, {pipeline_mode = #tpu.pipeline_mode<synchronous>, transform_indices = @transform_1, window_bounds = array<i64: 1024, 128>}, {pipeline_mode = #tpu.pipeline_mode<synchronous>, transform_indices = @transform_2, window_bounds = array<i64: 1, 128>}, {pipeline_mode = #tpu.pipeline_mode<synchronous>, transform_indices = @transform_3, window_bounds = array<i64: 128, 128>}, {pipeline_mode = #tpu.pipeline_mode<synchronous>, transform_indices = @transform_4, window_bounds = array<i64: 1, 128>}, {transform_indices = @transform_5, window_bounds = array<i64: 2, 128>}]} {
    %c0 = arith.constant 0 : index
    %c0_0 = arith.constant 0 : index
    %0 = vector.load %arg1[%c0, %c0_0] : memref<2x1024xf32, #tpu.memory_space<vmem>>, vector<2x1024xf32>
    %c0_1 = arith.constant 0 : index
    %c0_2 = arith.constant 0 : index
    %1 = vector.load %arg2[%c0_1, %c0_2] : memref<1024x128xf32, #tpu.memory_space<vmem>>, vector<1024x128xf32>
    %cst = arith.constant dense<0.000000e+00> : vector<2x128xf32>
    %2 = tpu.matmul %0, %1, %cst {dimension_numbers = #tpu.dot_dimension_numbers<[1], [0], [0], [1], [0, 0, 1, 1], [], []>} : vector<2x1024xf32>, vector<1024x128xf32>, vector<2x128xf32> -> vector<2x128xf32>
    %c0_3 = arith.constant 0 : index
    %c0_4 = arith.constant 0 : index
    %3 = vector.load %arg3[%c0_3, %c0_4] : memref<1x128xf32, #tpu.memory_space<vmem>>, vector<1x128xf32>
    %4 = vector.broadcast %3 : vector<1x128xf32> to vector<2x128xf32>
    %5 = arith.addf %2, %4 : vector<2x128xf32>
    %cst_5 = arith.constant 0.000000e+00 : f32
    %6 = vector.broadcast %cst_5 : f32 to vector<2x128xf32>
    %7 = arith.maximumf %5, %6 : vector<2x128xf32>
    %c0_6 = arith.constant 0 : index
    %c0_7 = arith.constant 0 : index
    %8 = vector.load %arg4[%c0_6, %c0_7] : memref<128x128xf32, #tpu.memory_space<vmem>>, vector<128x128xf32>
    %cst_8 = arith.constant dense<0.000000e+00> : vector<2x128xf32>
    %9 = tpu.matmul %7, %8, %cst_8 {dimension_numbers = #tpu.dot_dimension_numbers<[1], [0], [0], [1], [0, 0, 1, 1], [], []>} : vector<2x128xf32>, vector<128x128xf32>, vector<2x128xf32> -> vector<2x128xf32>
    %c0_9 = arith.constant 0 : index
    %c0_10 = arith.constant 0 : index
    %10 = vector.load %arg5[%c0_9, %c0_10] : memref<1x128xf32, #tpu.memory_space<vmem>>, vector<1x128xf32>
    %11 = vector.broadcast %10 : vector<1x128xf32> to vector<2x128xf32>
    %12 = arith.addf %9, %11 : vector<2x128xf32>
    %c0_11 = arith.constant 0 : index
    %c0_12 = arith.constant 0 : index
    %13 = vector.load %arg6[%c0_11, %c0_12] : memref<2x128xf32, #tpu.memory_space<vmem>>, vector<2x128xf32>
    tpu.vector_store %arg6[%c0_11, %c0_12], %12 {strides = array<i32>} : memref<2x128xf32, #tpu.memory_space<vmem>>, vector<2x128xf32>,
    return
  }
  func.func @transform_0(%arg0: i32) -> (i32, i32) {
    %c0_i32 = arith.constant 0 : i32
    %c0_i32_0 = arith.constant 0 : i32
    return %arg0, %c0_i32 : i32, i32
  }
  func.func @transform_1(%arg0: i32) -> (i32, i32) {
    %c0_i32 = arith.constant 0 : i32
    %c0_i32_0 = arith.constant 0 : i32
    %c0_i32_1 = arith.constant 0 : i32
    return %c0_i32, %c0_i32_0 : i32, i32
  }
  func.func @transform_2(%arg0: i32) -> (i32, i32) {
    %c0_i32 = arith.constant 0 : i32
    %c0_i32_0 = arith.constant 0 : i32
    %c0_i32_1 = arith.constant 0 : i32
    return %c0_i32, %c0_i32_0 : i32, i32
  }
  func.func @transform_3(%arg0: i32) -> (i32, i32) {
    %c0_i32 = arith.constant 0 : i32
    %c0_i32_0 = arith.constant 0 : i32
    %c0_i32_1 = arith.constant 0 : i32
    return %c0_i32, %c0_i32_0 : i32, i32
  }
  func.func @transform_4(%arg0: i32) -> (i32, i32) {
    %c0_i32 = arith.constant 0 : i32
    %c0_i32_0 = arith.constant 0 : i32
    %c0_i32_1 = arith.constant 0 : i32
    return %c0_i32, %c0_i32_0 : i32, i32
  }
  func.func @transform_5(%arg0: i32) -> (i32, i32) {
    %c0_i32 = arith.constant 0 : i32
    %c0_i32_0 = arith.constant 0 : i32
    return %arg0, %c0_i32 : i32, i32
  }
}

</mosaic_0001>

<bundles_post_ra>
// kernel: tpu_custom_call.1
= control target key start
LH: loop header
LB: loop body
LE: loop exit
PB: predicated region body
PF: predicated region fallthrough
CT: control target
= control target key end

     0   :  { %10 = vsyncpa [#allocation3], 0  ;;  %s1195_s0 = inlined_call_operand.hbm [shape: f32[2,1024], index: 0, kind: input, shape index: {}]   ;;  %s1196_s1 = inlined_call_operand.hbm [shape: f32[1024,128], index: 1, kind: input, shape index: {}]   ;;  %s1197_s2 = inlined_call_operand.vmem [shape: f32[1,128], index: 2, kind: input, shape index: {}]   ;;  %s1198_s3 = inlined_call_operand.hbm [shape: f32[128,128], index: 3, kind: input, shape index: {}]   ;;  %s1199_s4 = inlined_call_operand.vmem [shape: f32[1,128], index: 4, kind: input, shape index: {}]   ;;  %s1200_s5 = inlined_call_operand.hbm [shape: f32[2,128], index: 5, kind: output, shape index: {}]  }
   0x1   :  { %11 = vsyncpa [#allocation6], 0 }
   0x2   :  { %12 = vsyncpa [#allocation4], 0  ;;  %s1084_s18 = smov [#allocation5]   ;;  %s990_s22 = scalar_lea.hbm %s1196_s1, 16384 }
   0x3   :  { %s28_s19 = sshll.u32 %s1084_s18, 4  ;;  %p991_p0 = scmp.ne.s32.totalorder %s1196_s1, %s990_s22  ;;  %s29_s19 = int_to_ptr.vmem [resolvable:$true] %s28_s19 }
   0x4   :  { %p994_p1 = scmp.lt.u32.totalorder %s990_s22, %s1196_s1 }
   0x6   :  { %p996_p2 = pnand %p994_p1, %p991_p0 }
   0x8   :  { %999 = shalt.err (!%p996_p2)
}
   0x9   :  { %s1000_s27 = scalar_lea.vmem %s29_s19, 16384  ;;  %p1005_p4 = scmp.lt.s32.totalorder %s29_s19, %s29_s19 }
   0xa   :  { %p1001_p3 = scmp.ne.s32.totalorder %s29_s19, %s1000_s27  ;;  %p1006_p5 = scmp.lt.s32.totalorder %s1000_s27, %s1000_s27 }
   0xc   :  { %p1007_p6 = por %p1006_p5, %p1005_p4 }
   0xe   :  { %p1008_p7 = pnand %p1007_p6, %p1001_p3 }
  0x10   :  { %1011 = shalt.err (!%p1008_p7)
}
  0x11   :  { %s1085_s28 = smov 128   ;;  %s1086_s29 = smov 8  }
  0x12   :  { %34 = dma.hbm_to_vmem [thread:$0]  %s1196_s1, 16384, %s29_s19, [#allocation6], %s1085_s28, %s1085_s28, %s1086_s29  }
  0x13   :  { %s1087_s7 = smov [#allocation2]   ;;  %s1088_s9 = smov [#allocation7]  }
  0x14   :  { %s19_s8 = sshll.u32 %s1087_s7, 4  ;;  %s42_s10 = sshll.u32 %s1088_s9, 4  ;;  %s20_s8 = int_to_ptr.vmem [resolvable:$true] %s19_s8  ;;  %s43_s10 = int_to_ptr.vmem [resolvable:$true] %s42_s10 }
  0x15   :  { %s1012_s13 = scalar_lea.hbm %s1195_s0, 256 }
  0x16   :  { %p1013_p8 = scmp.ne.s32.totalorder %s1195_s0, %s1012_s13  ;;  %p1016_p9 = scmp.lt.u32.totalorder %s1012_s13, %s1195_s0 }
  0x18   :  { %p1018_p10 = pnand %p1016_p9, %p1013_p8 }
  0x1a   :  { %1021 = shalt.err (!%p1018_p10)
}
  0x1b   :  { %s1022_s1 = scalar_lea.vmem %s20_s8, 256  ;;  %p1027_p12 = scmp.lt.s32.totalorder %s20_s8, %s20_s8 }
  0x1c   :  { %p1023_p11 = scmp.ne.s32.totalorder %s20_s8, %s1022_s1  ;;  %p1028_p13 = scmp.lt.s32.totalorder %s1022_s1, %s1022_s1 }
  0x1e   :  { %p1029_p0 = por %p1028_p13, %p1027_p12 }
  0x20   :  { %p1030_p1 = pnand %p1029_p0, %p1023_p11 }
  0x22   :  { %1033 = shalt.err (!%p1030_p1)
}
  0x23   :  { %22 = dma.hbm_to_vmem [thread:$0]  %s1195_s0, 256, %s20_s8, [#allocation3]  }
  0x24   :  { %s1034_s22 = scalar_lea.hbm %s1198_s3, 2048 }
  0x25   :  { %p1035_p2 = scmp.ne.s32.totalorder %s1198_s3, %s1034_s22  ;;  %p1038_p3 = scmp.lt.u32.totalorder %s1034_s22, %s1198_s3 }
  0x27   :  { %p1040_p4 = pnand %p1038_p3, %p1035_p2 }
  0x29   :  { %1043 = shalt.err (!%p1040_p4)
}
  0x2a   :  { %s1044_s27 = scalar_lea.vmem %s43_s10, 2048  ;;  %p1049_p6 = scmp.lt.s32.totalorder %s43_s10, %s43_s10 }
  0x2b   :  { %p1045_p5 = scmp.ne.s32.totalorder %s43_s10, %s1044_s27  ;;  %p1050_p7 = scmp.lt.s32.totalorder %s1044_s27, %s1044_s27 }
  0x2d   :  { %p1051_p8 = por %p1050_p7, %p1049_p6 }
  0x2f   :  { %p1052_p9 = pnand %p1051_p8, %p1045_p5 }
  0x31   :  { %1055 = shalt.err (!%p1052_p9)
}
  0x32   :  { %48 = dma.hbm_to_vmem [thread:$0]  %s1198_s3, 2048, %s43_s10, [#allocation6], %s1085_s28, %s1085_s28, %s1086_s29  }
  0x33   :  { %1078 = dma.done.wait [#allocation3], 256  }
  0x34   :  { %1079 = vsyncadd [#allocation3], 4294967040 }
  0x35   :  { %1080 = dma.done.wait [#allocation6], 18432  }
  0x36   :  { %1081 = vsyncadd [#allocation6], 4294948864  ;;  %v78_v0 = vld [vmem:[#allocation5 + $0x80] sm:$0xff]  ;;  %v79_v1 = vld [vmem:[#allocation5 + $0x88] sm:$0xff]  ;;  %v1089_v47 = vmov 1983009808   ;;  %v203_v49 = vlaneseq }
  0x37   :  { %v62_v2 = vld [vmem:[#allocation5] sm:$0xff]  ;;  %v826_v3 = vpack.c.bf16 %v79_v1, %v78_v0  ;;  %v63_v4 = vld [vmem:[#allocation5 + $0x8] sm:$0xff]  ;;  %v80_v11 = vld [vmem:[#allocation5 + $0x90] sm:$0xff]  ;;  %v201_v48 = vunpack.c.l.s4 %v1089_v47  ;;  %vm1091_vm0 = vmmov 0  }
  0x38   :  { %v110_v5 = vld [vmem:[#allocation5 + $0x180] sm:$0xff]  ;;  %v111_v6 = vld [vmem:[#allocation5 + $0x188] sm:$0xff]  ;;  %v828_v7 = vpack.c.bf16 %v63_v4, %v62_v2  ;;  %v81_v13 = vld [vmem:[#allocation5 + $0x98] sm:$0xff]  ;;  %v204_v0 = vshrl.u32 %v203_v49, 7 }
  0x39   :  { %v858_v8 = vpack.c.bf16 %v111_v6, %v110_v5  ;;  %v94_v9 = vld [vmem:[#allocation5 + $0x100] sm:$0xff]  ;;  %v95_v10 = vld [vmem:[#allocation5 + $0x108] sm:$0xff]  ;;  %827 = vmatprep.subr.bf16.mxu0 %v826_v3  ;;  %v64_v14 = vld [vmem:[#allocation5 + $0x10] sm:$0xff]  ;;  %v830_v16 = vpack.c.bf16 %v81_v13, %v80_v11  ;;  %v202_v63 = vunpack.c.0.s8 %v201_v48 }
  0x3a   :  { %v860_v12 = vpack.c.bf16 %v95_v10, %v94_v9  ;;  %v65_v15 = vld [vmem:[#allocation5 + $0x18] sm:$0xff]  ;;  %829 = vmatpush3.bf16.msra.mxu0 %v828_v7  ;;  %v112_v18 = vld [vmem:[#allocation5 + $0x190] sm:$0xff]  ;;  %v82_v23 = vld [vmem:[#allocation5 + $0xa0] sm:$0xff] }
  0x3b   :  { %859 = vmatprep.subr.bf16.mxu1 %v858_v8  ;;  %v832_v17 = vpack.c.bf16 %v65_v15, %v64_v14  ;;  %v113_v19 = vld [vmem:[#allocation5 + $0x198] sm:$0xff]  ;;  %v96_v20 = vld [vmem:[#allocation5 + $0x110] sm:$0xff]  ;;  %v83_v24 = vld [vmem:[#allocation5 + $0xa8] sm:$0xff]  ;;  %831 = vmatprep.subr.bf16.mxu0 %v830_v16  ;;  %v1166_v13 = vsub.s32 %v202_v63, %v204_v0 }
  0x3c   :  { %861 = vmatpush3.bf16.msra.mxu1 %v860_v12  ;;  %v862_v21 = vpack.c.bf16 %v113_v19, %v112_v18  ;;  %v97_v22 = vld [vmem:[#allocation5 + $0x118] sm:$0xff]  ;;  %v834_v26 = vpack.c.bf16 %v83_v24, %v82_v23  ;;  %v66_v27 = vld [vmem:[#allocation5 + $0x20] sm:$0xff]  ;;  %v67_v28 = vld [vmem:[#allocation5 + $0x28] sm:$0xff] }
  0x3d   :  { %v864_v25 = vpack.c.bf16 %v97_v22, %v96_v20  ;;  %v114_v29 = vld [vmem:[#allocation5 + $0x1a0] sm:$0xff]  ;;  %v115_v30 = vld [vmem:[#allocation5 + $0x1a8] sm:$0xff]  ;;  %v836_v33 = vpack.c.bf16 %v67_v28, %v66_v27  ;;  %v84_v35 = vld [vmem:[#allocation5 + $0xb0] sm:$0xff] }
  0x3e   :  { %863 = vmatprep.subr.bf16.mxu1 %v862_v21  ;;  %v98_v31 = vld [vmem:[#allocation5 + $0x120] sm:$0xff]  ;;  %v99_v32 = vld [vmem:[#allocation5 + $0x128] sm:$0xff]  ;;  %833 = vmatpush3.bf16.msra.mxu0 %v832_v17  ;;  %v866_v34 = vpack.c.bf16 %v115_v30, %v114_v29  ;;  %v85_v36 = vld [vmem:[#allocation5 + $0xb8] sm:$0xff] }
  0x3f   :  { %v68_v37 = vld [vmem:[#allocation5 + $0x30] sm:$0xff]  ;;  %835 = vmatprep.subr.bf16.mxu0 %v834_v26  ;;  %v868_v38 = vpack.c.bf16 %v99_v32, %v98_v31  ;;  %v838_v39 = vpack.c.bf16 %v85_v36, %v84_v35  ;;  %v69_v40 = vld [vmem:[#allocation5 + $0x38] sm:$0xff]  ;;  %v86_v46 = vld [vmem:[#allocation5 + $0xc0] sm:$0xff] }
  0x40   :  { %865 = vmatpush3.bf16.msra.mxu1 %v864_v25  ;;  %v116_v41 = vld [vmem:[#allocation5 + $0x1b0] sm:$0xff]  ;;  %v117_v42 = vld [vmem:[#allocation5 + $0x1b8] sm:$0xff]  ;;  %v87_v50 = vld [vmem:[#allocation5 + $0xc8] sm:$0xff]  ;;  %v840_v51 = vpack.c.bf16 %v69_v40, %v68_v37 }
  0x41   :  { %867 = vmatprep.subr.bf16.mxu1 %v866_v34  ;;  %v870_v43 = vpack.c.bf16 %v117_v42, %v116_v41  ;;  %v100_v44 = vld [vmem:[#allocation5 + $0x130] sm:$0xff]  ;;  %v101_v45 = vld [vmem:[#allocation5 + $0x138] sm:$0xff]  ;;  %v118_v52 = vld [vmem:[#allocation5 + $0x1c0] sm:$0xff]  ;;  %v842_v55 = vpack.c.bf16 %v87_v50, %v86_v46 }
  0x42   :  { %837 = vmatpush3.bf16.msra.mxu0 %v836_v33  ;;  %v119_v53 = vld [vmem:[#allocation5 + $0x1c8] sm:$0xff]  ;;  %v872_v54 = vpack.c.bf16 %v101_v45, %v100_v44  ;;  %v70_v56 = vld [vmem:[#allocation5 + $0x40] sm:$0xff]  ;;  %v88_v61 = vld [vmem:[#allocation5 + $0xd0] sm:$0xff] }
  0x43   :  { %839 = vmatprep.subr.bf16.mxu0 %v838_v39  ;;  %v71_v57 = vld [vmem:[#allocation5 + $0x48] sm:$0xff]  ;;  %v102_v58 = vld [vmem:[#allocation5 + $0x140] sm:$0xff]  ;;  %v874_v59 = vpack.c.bf16 %v119_v53, %v118_v52  ;;  %v89_v62 = vld [vmem:[#allocation5 + $0xd8] sm:$0xff] }
  0x44   :  { %869 = vmatpush3.bf16.msra.mxu1 %v868_v38  ;;  %v103_v60 = vld [vmem:[#allocation5 + $0x148] sm:$0xff]  ;;  %v120_v1 = vld [vmem:[#allocation5 + $0x1d0] sm:$0xff]  ;;  %v121_v2 = vld [vmem:[#allocation5 + $0x1d8] sm:$0xff]  ;;  %v844_v3 = vpack.c.bf16 %v71_v57, %v70_v56  ;;  %v846_v5 = vpack.c.bf16 %v89_v62, %v88_v61 }
  0x45   :  { %871 = vmatprep.subr.bf16.mxu1 %v870_v43  ;;  %v876_v4 = vpack.c.bf16 %v103_v60, %v102_v58  ;;  %v72_v6 = vld [vmem:[#allocation5 + $0x50] sm:$0xff]  ;;  %v73_v7 = vld [vmem:[#allocation5 + $0x58] sm:$0xff]  ;;  %v878_v9 = vpack.c.bf16 %v121_v2, %v120_v1  ;;  %v90_v11 = vld [vmem:[#allocation5 + $0xe0] sm:$0xff] }
  0x46   :  { %841 = vmatpush3.bf16.msra.mxu0 %v840_v51  ;;  %v104_v8 = vld [vmem:[#allocation5 + $0x150] sm:$0xff]  ;;  %v105_v10 = vld [vmem:[#allocation5 + $0x158] sm:$0xff]  ;;  %v91_v12 = vld [vmem:[#allocation5 + $0xe8] sm:$0xff]  ;;  %v848_v16 = vpack.c.bf16 %v73_v7, %v72_v6 }
  0x47   :  { %843 = vmatprep.subr.bf16.mxu0 %v842_v55  ;;  %v122_v14 = vld [vmem:[#allocation5 + $0x1e0] sm:$0xff]  ;;  %v123_v15 = vld [vmem:[#allocation5 + $0x1e8] sm:$0xff]  ;;  %v880_v18 = vpack.c.bf16 %v105_v10, %v104_v8  ;;  %v850_v19 = vpack.c.bf16 %v91_v12, %v90_v11  ;;  %v60_v22 = vld [vmem:[#allocation2] sm:$0xff] }
  0x48   :  { %873 = vmatpush3.bf16.msra.mxu1 %v872_v54  ;;  %v74_v17 = vld [vmem:[#allocation5 + $0x60] sm:$0xff]  ;;  %v75_v20 = vld [vmem:[#allocation5 + $0x68] sm:$0xff]  ;;  %v882_v23 = vpack.c.bf16 %v123_v15, %v122_v14  ;;  %v92_v25 = vld [vmem:[#allocation5 + $0xf0] sm:$0xff]  ;;  %v206_v27 = vrot.slane %v60_v22, %v1166_v13  ;;  %v199_v28 = vcombine.high %v60_v22, %v60_v22 }
  0x49   :  { %875 = vmatprep.subr.bf16.mxu1 %v874_v59  ;;  %v106_v21 = vld [vmem:[#allocation5 + $0x160] sm:$0xff]  ;;  %v107_v24 = vld [vmem:[#allocation5 + $0x168] sm:$0xff]  ;;  %v93_v26 = vld [vmem:[#allocation5 + $0xf8] sm:$0xff]  ;;  %v852_v31 = vpack.c.bf16 %v75_v20, %v74_v17 }
  0x4a   :  { %845 = vmatpush3.bf16.msra.mxu0 %v844_v3  ;;  %v124_v29 = vld [vmem:[#allocation5 + $0x1f0] sm:$0xff]  ;;  %v125_v30 = vld [vmem:[#allocation5 + $0x1f8] sm:$0xff]  ;;  %v214_v32 = vcombine.high %v206_v27, %v206_v27  ;;  %v213_v33 = vrot.slane %v199_v28, %v1166_v13  ;;  %v884_v34 = vpack.c.bf16 %v107_v24, %v106_v21  ;;  %v854_v35 = vpack.c.bf16 %v93_v26, %v92_v25  ;;  %v142_v41 = vld [vmem:[#allocation5 + $0x280] sm:$0xff] }
  0x4b   :  { %847 = vmatprep.subr.bf16.mxu0 %v846_v5  ;;  %v76_v36 = vld [vmem:[#allocation5 + $0x70] sm:$0xff]  ;;  %v77_v37 = vld [vmem:[#allocation5 + $0x78] sm:$0xff]  ;;  %v886_v39 = vpack.c.bf16 %v125_v30, %v124_v29  ;;  %v143_v42 = vld [vmem:[#allocation5 + $0x288] sm:$0xff] }
  0x4c   :  { %877 = vmatpush3.bf16.msra.mxu1 %v876_v4  ;;  %v108_v38 = vld [vmem:[#allocation5 + $0x170] sm:$0xff]  ;;  %v109_v40 = vld [vmem:[#allocation5 + $0x178] sm:$0xff]  ;;  %305 = vmatprep.mubr.f32.mxu0 %v214_v32  ;;  %v215_v43 = vcombine.high %v213_v33, %v213_v33  ;;  %v174_v44 = vld [vmem:[#allocation5 + $0x380] sm:$0xff]  ;;  %v856_v46 = vpack.c.bf16 %v77_v37, %v76_v36  ;;  %v890_v48 = vpack.c.bf16 %v143_v42, %v142_v41 }
  0x4d   :  { %879 = vmatprep.subr.bf16.mxu1 %v878_v9  ;;  %v175_v45 = vld [vmem:[#allocation5 + $0x388] sm:$0xff]  ;;  %v888_v47 = vpack.c.bf16 %v109_v40, %v108_v38  ;;  %v126_v49 = vld [vmem:[#allocation5 + $0x200] sm:$0xff]  ;;  %v144_v54 = vld [vmem:[#allocation5 + $0x290] sm:$0xff] }
  0x4e   :  { %849 = vmatpush3.bf16.msra.mxu0 %v848_v16  ;;  %375 = vmatprep.mubr.f32.mxu1 %v215_v43  ;;  %v127_v50 = vld [vmem:[#allocation5 + $0x208] sm:$0xff]  ;;  %v158_v51 = vld [vmem:[#allocation5 + $0x300] sm:$0xff]  ;;  %v922_v52 = vpack.c.bf16 %v175_v45, %v174_v44  ;;  %v145_v55 = vld [vmem:[#allocation5 + $0x298] sm:$0xff] }
  0x4f   :  { %851 = vmatprep.subr.bf16.mxu0 %v850_v19  ;;  %v159_v53 = vld [vmem:[#allocation5 + $0x308] sm:$0xff]  ;;  %v176_v56 = vld [vmem:[#allocation5 + $0x390] sm:$0xff]  ;;  %v177_v57 = vld [vmem:[#allocation5 + $0x398] sm:$0xff]  ;;  %v892_v58 = vpack.c.bf16 %v127_v50, %v126_v49  ;;  %v894_v60 = vpack.c.bf16 %v145_v55, %v144_v54 }
  0x50   :  { %881 = vmatpush3.bf16.msra.mxu1 %v880_v18  ;;  %v924_v59 = vpack.c.bf16 %v159_v53, %v158_v51  ;;  %v128_v61 = vld [vmem:[#allocation5 + $0x210] sm:$0xff]  ;;  %v129_v62 = vld [vmem:[#allocation5 + $0x218] sm:$0xff]  ;;  %v926_v0 = vpack.c.bf16 %v177_v57, %v176_v56  ;;  %v146_v2 = vld [vmem:[#allocation5 + $0x2a0] sm:$0xff] }
  0x51   :  { %883 = vmatprep.subr.bf16.mxu1 %v882_v23  ;;  %v160_v63 = vld [vmem:[#allocation5 + $0x310] sm:$0xff]  ;;  %v161_v1 = vld [vmem:[#allocation5 + $0x318] sm:$0xff]  ;;  %v147_v3 = vld [vmem:[#allocation5 + $0x2a8] sm:$0xff]  ;;  %v896_v6 = vpack.c.bf16 %v129_v62, %v128_v61 }
  0x52   :  { %853 = vmatpush3.bf16.msra.mxu0 %v852_v31  ;;  %v178_v4 = vld [vmem:[#allocation5 + $0x3a0] sm:$0xff]  ;;  %v179_v5 = vld [vmem:[#allocation5 + $0x3a8] sm:$0xff]  ;;  %v928_v7 = vpack.c.bf16 %v161_v1, %v160_v63  ;;  %v898_v8 = vpack.c.bf16 %v147_v3, %v146_v2  ;;  %v148_v15 = vld [vmem:[#allocation5 + $0x2b0] sm:$0xff] }
  0x53   :  { %855 = vmatprep.subr.bf16.mxu0 %v854_v35  ;;  %v130_v9 = vld [vmem:[#allocation5 + $0x220] sm:$0xff]  ;;  %v131_v10 = vld [vmem:[#allocation5 + $0x228] sm:$0xff]  ;;  %v930_v12 = vpack.c.bf16 %v179_v5, %v178_v4  ;;  %v149_v16 = vld [vmem:[#allocation5 + $0x2b8] sm:$0xff] }
  0x54   :  { %885 = vmatpush3.bf16.msra.mxu1 %v884_v34  ;;  %v162_v11 = vld [vmem:[#allocation5 + $0x320] sm:$0xff]  ;;  %v163_v14 = vld [vmem:[#allocation5 + $0x328] sm:$0xff]  ;;  %v180_v17 = vld [vmem:[#allocation5 + $0x3b0] sm:$0xff]  ;;  %v900_v19 = vpack.c.bf16 %v131_v10, %v130_v9  ;;  %v902_v21 = vpack.c.bf16 %v149_v16, %v148_v15 }
  0x55   :  { %887 = vmatprep.subr.bf16.mxu1 %v886_v39  ;;  %v181_v18 = vld [vmem:[#allocation5 + $0x3b8] sm:$0xff]  ;;  %v932_v20 = vpack.c.bf16 %v163_v14, %v162_v11  ;;  %v132_v22 = vld [vmem:[#allocation5 + $0x230] sm:$0xff]  ;;  %v151_v28 = vld [vmem:[#allocation5 + $0x2c8] sm:$0xff] }
  0x56   :  { %857 = vmatpush3.bf16.msra.mxu0 %v856_v46  ;;  %v133_v23 = vld [vmem:[#allocation5 + $0x238] sm:$0xff]  ;;  %v164_v24 = vld [vmem:[#allocation5 + $0x330] sm:$0xff]  ;;  %v934_v25 = vpack.c.bf16 %v181_v18, %v180_v17  ;;  %v182_v29 = vld [vmem:[#allocation5 + $0x3c0] sm:$0xff] }
  0x57   :  { %891 = vmatprep.subr.bf16.mxu0 %v890_v48  ;;  %v165_v26 = vld [vmem:[#allocation5 + $0x338] sm:$0xff]  ;;  %v183_v30 = vld [vmem:[#allocation5 + $0x3c8] sm:$0xff]  ;;  %v904_v32 = vpack.c.bf16 %v133_v23, %v132_v22  ;;  %v134_v37 = vld [vmem:[#allocation5 + $0x240] sm:$0xff]  ;;  %v1090_v22 = vmov 0.0|0.0  }
  0x58   :  { %889 = vmatpush3.bf16.msra.mxu1 %v888_v47  ;;  %v61_v31 = vld [vmem:[#allocation2 + $0x8] sm:$0xff]  ;;  %v936_v35 = vpack.c.bf16 %v165_v26, %v164_v24  ;;  %v135_v38 = vld [vmem:[#allocation5 + $0x248] sm:$0xff]  ;;  %v166_v39 = vld [vmem:[#allocation5 + $0x340] sm:$0xff]  ;;  %v938_v40 = vpack.c.bf16 %v183_v30, %v182_v29 }
  0x59   :  { %923 = vmatprep.subr.bf16.mxu1 %v922_v52  ;;  %306 = vmatmul.mubr.f32.vlgmr.msra.gmra.mrb[0].mxu0 %v206_v27  ;;  %v150_v27 = vld [vmem:[#allocation5 + $0x2c0] sm:$0xff]  ;;  %v216_v34 = vcombine.high %v61_v31, %v61_v31  ;;  %v167_v41 = vld [vmem:[#allocation5 + $0x348] sm:$0xff]  ;;  %v152_v42 = vld [vmem:[#allocation5 + $0x2d0] sm:$0xff]  ;;  %v908_v48 = vpack.c.bf16 %v135_v38, %v134_v37 }
  0x5a   :  { %893 = vmatpush3.bf16.msra.mxu0 %v892_v58  ;;  %v906_v36 = vpack.c.bf16 %v151_v28, %v150_v27  ;;  %v153_v43 = vld [vmem:[#allocation5 + $0x2d8] sm:$0xff]  ;;  %v184_v46 = vld [vmem:[#allocation5 + $0x3d0] sm:$0xff]  ;;  %v940_v50 = vpack.c.bf16 %v167_v41, %v166_v39  ;;  %v154_v57 = vld [vmem:[#allocation5 + $0x2e0] sm:$0xff] }
  0x5b   :  { %376 = vmatmul.mubr.f32.vlgmr.msra.gmra.mrb[0].mxu1 %v213_v33  ;;  %895 = vmatprep.subr.bf16.mxu0 %v894_v60  ;;  %v1171_v33 = vrot.slane %v61_v31, %v1166_v13  ;;  %v230_v45 = vrot.slane %v216_v34, %v1166_v13  ;;  %v185_v47 = vld [vmem:[#allocation5 + $0x3d8] sm:$0xff]  ;;  %v910_v51 = vpack.c.bf16 %v153_v43, %v152_v42  ;;  %v136_v52 = vld [vmem:[#allocation5 + $0x250] sm:$0xff]  ;;  %v155_v58 = vld [vmem:[#allocation5 + $0x2e8] sm:$0xff] }
  0x5c   :  { %925 = vmatpush3.bf16.msra.mxu1 %v924_v59  ;;  %v137_v53 = vld [vmem:[#allocation5 + $0x258] sm:$0xff]  ;;  %v168_v54 = vld [vmem:[#allocation5 + $0x350] sm:$0xff]  ;;  %v942_v55 = vpack.c.bf16 %v185_v47, %v184_v46  ;;  %v186_v13 = vld [vmem:[#allocation5 + $0x3e0] sm:$0xff]  ;;  %v914_v62 = vpack.c.bf16 %v155_v58, %v154_v57 }
  0x5d   :  { %927 = vmatprep.subr.bf16.mxu1 %v926_v0  ;;  %v231_v44 = vcombine.high %v1171_v33, %v1171_v33  ;;  %v232_v49 = vcombine.high %v230_v45, %v230_v45  ;;  %v169_v56 = vld [vmem:[#allocation5 + $0x358] sm:$0xff]  ;;  %v187_v59 = vld [vmem:[#allocation5 + $0x3e8] sm:$0xff]  ;;  %v912_v60 = vpack.c.bf16 %v137_v53, %v136_v52  ;;  %v138_v63 = vld [vmem:[#allocation5 + $0x260] sm:$0xff] }
  0x5e   :  { %897 = vmatpush3.bf16.msra.mxu0 %v896_v6  ;;  %v944_v61 = vpack.c.bf16 %v169_v56, %v168_v54  ;;  %v139_v0 = vld [vmem:[#allocation5 + $0x268] sm:$0xff]  ;;  %v170_v1 = vld [vmem:[#allocation5 + $0x360] sm:$0xff]  ;;  %v946_v2 = vpack.c.bf16 %v187_v59, %v186_v13  ;;  %v156_v4 = vld [vmem:[#allocation5 + $0x2f0] sm:$0xff] }
  0x5f   :  { %899 = vmatprep.subr.bf16.mxu0 %v898_v8  ;;  %445 = vmatprep.mubr.f32.mxu0 %v231_v44  ;;  %v171_v3 = vld [vmem:[#allocation5 + $0x368] sm:$0xff]  ;;  %v157_v5 = vld [vmem:[#allocation5 + $0x2f8] sm:$0xff]  ;;  %v188_v6 = vld [vmem:[#allocation5 + $0x3f0] sm:$0xff]  ;;  %v916_v8 = vpack.c.bf16 %v139_v0, %v138_v63  ;;  %v1092_v44 = vmov 0.0  }
  0x60   :  { %929 = vmatpush3.bf16.msra.mxu1 %v928_v7  ;;  %515 = vmatprep.mubr.f32.mxu1 %v232_v49  ;;  %v189_v7 = vld [vmem:[#allocation5 + $0x3f8] sm:$0xff]  ;;  %v948_v9 = vpack.c.bf16 %v171_v3, %v170_v1  ;;  %v918_v10 = vpack.c.bf16 %v157_v5, %v156_v4  ;;  %v140_v11 = vld [vmem:[#allocation5 + $0x270] sm:$0xff]  ;;  %v526_v26 = vld [vmem:[#allocation7 + $0x20] sm:$0xff] }
  0x61   :  { %931 = vmatprep.subr.bf16.mxu1 %v930_v12  ;;  %v141_v12 = vld [vmem:[#allocation5 + $0x278] sm:$0xff]  ;;  %v950_v14 = vpack.c.bf16 %v189_v7, %v188_v6  ;;  %v172_v15 = vld [vmem:[#allocation5 + $0x370] sm:$0xff]  ;;  %v527_v27 = vld [vmem:[#allocation7 + $0x28] sm:$0xff] }
  0x62   :  { %901 = vmatpush3.bf16.msra.mxu0 %v900_v19  ;;  %v173_v16 = vld [vmem:[#allocation5 + $0x378] sm:$0xff]  ;;  %v920_v17 = vpack.c.bf16 %v141_v12, %v140_v11  ;;  %v522_v19 = vld [vmem:[#allocation7] sm:$0xff]  ;;  %v961_v28 = vpack.c.bf16 %v527_v27, %v526_v26  ;;  %v528_v29 = vld [vmem:[#allocation7 + $0x30] sm:$0xff] }
  0x63   :  { %903 = vmatprep.subr.bf16.mxu0 %v902_v21  ;;  %v952_v18 = vpack.c.bf16 %v173_v16, %v172_v15  ;;  %v524_v21 = vld [vmem:[#allocation7 + $0x10] sm:$0xff]  ;;  %v525_v24 = vld [vmem:[#allocation7 + $0x18] sm:$0xff]  ;;  %v534_v38 = vld [vmem:[#allocation7 + $0x60] sm:$0xff] }
  0x64   :  { %933 = vmatpush3.bf16.msra.mxu1 %v932_v20  ;;  %v523_v20 = vld [vmem:[#allocation7 + $0x8] sm:$0xff]  ;;  %v529_v30 = vld [vmem:[#allocation7 + $0x38] sm:$0xff]  ;;  %v536_v41 = vld [vmem:[#allocation7 + $0x70] sm:$0xff] }
  0x65   :  { %935 = vmatprep.subr.bf16.mxu1 %v934_v25  ;;  %v955_v23 = vpack.c.bf16 %v523_v20, %v522_v19  ;;  %v958_v25 = vpack.c.bf16 %v525_v24, %v524_v21  ;;  %v964_v31 = vpack.c.bf16 %v529_v30, %v528_v29  ;;  %v535_v39 = vld [vmem:[#allocation7 + $0x68] sm:$0xff]  ;;  %v537_v42 = vld [vmem:[#allocation7 + $0x78] sm:$0xff]  ;;  %v632_v46 = vld [vmem:[%s1197_s2] ss:$0 sm:$0xff]  ;;  %s1093_s2 = smov [#allocation8]  }
  0x66   :  { %905 = vmatpush3.bf16.msra.mxu0 %v904_v32  ;;  %v530_v32 = vld [vmem:[#allocation7 + $0x40] sm:$0xff]  ;;  %v976_v43 = vpack.c.bf16 %v537_v42, %v536_v41  ;;  %s622_s7 = sshll.u32 %s1093_s2, 4  ;;  %s623_s7 = int_to_ptr.vmem [resolvable:$true] %s622_s7 }
  0x67   :  { %907 = vmatprep.subr.bf16.mxu0 %v906_v36  ;;  %v533_v36 = vld [vmem:[#allocation7 + $0x58] sm:$0xff]  ;;  %s1056_s8 = scalar_lea.vmem %s623_s7, 32  ;;  %p1061_p11 = scmp.lt.s32.totalorder %s623_s7, %s623_s7 }
  0x68   :  { %937 = vmatpush3.bf16.msra.mxu1 %v936_v35  ;;  %v532_v35 = vld [vmem:[#allocation7 + $0x50] sm:$0xff]  ;;  %p1057_p10 = scmp.ne.s32.totalorder %s623_s7, %s1056_s8  ;;  %p1062_p12 = scmp.lt.s32.totalorder %s1056_s8, %s1056_s8 }
  0x69   :  { %939 = vmatprep.subr.bf16.mxu1 %v938_v40  ;;  %v970_v37 = vpack.c.bf16 %v533_v36, %v532_v35  ;;  %v973_v40 = vpack.c.bf16 %v535_v39, %v534_v38 }
  0x6a   :  { %909 = vmatpush3.bf16.msra.mxu0 %v908_v48  ;;  %p1063_p13 = por %p1062_p12, %p1061_p11 }
  0x6b   :  { %911 = vmatprep.subr.bf16.mxu0 %v910_v51 }
  0x6c   :  { %941 = vmatpush3.bf16.msra.mxu1 %v940_v50  ;;  %p1064_p0 = pnand %p1063_p13, %p1057_p10 }
  0x6d   :  { %943 = vmatprep.subr.bf16.mxu1 %v942_v55 }
  0x6e   :  { %913 = vmatpush3.bf16.msra.mxu0 %v912_v60 }
  0x6f   :  { %915 = vmatprep.subr.bf16.mxu0 %v914_v62  ;;  %v633_v62 = vld [vmem:[%s1199_s4] ss:$0 sm:$0xff] }
  0x70   :  { %945 = vmatpush3.bf16.msra.mxu1 %v944_v61 }
  0x71   :  { %947 = vmatprep.subr.bf16.mxu1 %v946_v2 }
  0x72   :  { %917 = vmatpush3.bf16.msra.mxu0 %v916_v8 }
  0x73   :  { %919 = vmatprep.subr.bf16.mxu0 %v918_v10 }
  0x74   :  { %949 = vmatpush3.bf16.msra.mxu1 %v948_v9 }
  0x75   :  { %951 = vmatprep.subr.bf16.mxu1 %v950_v14 }
  0x76   :  { %921 = vmatpush3.bf16.msra.mxu0 %v920_v17 }
  0x77   :  { %954 = vmatprep.subr.bf16.mxu0 %v1090_v22 }
  0x78   :  { %953 = vmatpush3.bf16.msra.mxu1 %v952_v18 }
  0x79   :  { %446 = vmatmul.mubr.f32.vlgmr.msra.gmra.mrb[2].mxu0 %v1171_v33  ;;  %v531_v33 = vld [vmem:[#allocation7 + $0x48] sm:$0xff] }
  0x7a   :  { %956 = vmatpush3.bf16.msra.mxu0 %v955_v23  ;;  %v967_v34 = vpack.c.bf16 %v531_v33, %v530_v32  ;;  %823 = vmatprep.mubr.msk.f32.mxu0 %vm1091_vm0, %v1092_v44 }
  0x7b   :  { %516 = vmatmul.mubr.f32.vlgmr.msra.gmra.mrb[2].mxu1 %v230_v45  ;;  %957 = vmatprep.subr.bf16.mxu0 %v1090_v22 }
  0x7e   :  { %959 = vmatpush3.bf16.msra.mxu0 %v958_v25 }
  0x7f   :  { %960 = vmatprep.subr.bf16.mxu0 %v1090_v22 }
  0x82   :  { %962 = vmatpush3.bf16.msra.mxu0 %v961_v28 }
  0x83   :  { %963 = vmatprep.subr.bf16.mxu0 %v1090_v22 }
  0x86   :  { %965 = vmatpush3.bf16.msra.mxu0 %v964_v31 }
  0x87   :  { %966 = vmatprep.subr.bf16.mxu0 %v1090_v22 }
  0x8a   :  { %968 = vmatpush3.bf16.msra.mxu0 %v967_v34 }
  0x8b   :  { %969 = vmatprep.subr.bf16.mxu0 %v1090_v22 }
  0x8e   :  { %971 = vmatpush3.bf16.msra.mxu0 %v970_v37 }
  0x8f   :  { %972 = vmatprep.subr.bf16.mxu0 %v1090_v22 }
  0x92   :  { %974 = vmatpush3.bf16.msra.mxu0 %v973_v40 }
  0x93   :  { %975 = vmatprep.subr.bf16.mxu0 %v1090_v22 }
  0x96   :  { %977 = vmatpush3.bf16.msra.mxu0 %v976_v43 }
 0x12c   :  { %v666_v45 = vpop.f32.mrb[0].mxu0 }
 0x12d   :  { %v667_v47 = vpop.f32.mrb[1].mxu0 }
 0x12e   :  { %v701_v48 = vpop.f32.mrb[0].mxu1  ;;  %v668_v49 = vadd.f32 %v667_v47, %v666_v45 }
 0x12f   :  { %v702_v50 = vpop.f32.mrb[1].mxu1 }
 0x130   :  { %v703_v51 = vadd.f32 %v702_v50, %v701_v48  ;;  %v308_v52 = vadd.f32 %v668_v49, %v632_v46 }
 0x132   :  { %v378_v53 = vadd.f32 %v703_v51, %v308_v52 }
 0x14c   :  { %v736_v54 = vpop.f32.mrb[2].mxu0 }
 0x14d   :  { %v737_v55 = vpop.f32.mrb[3].mxu0 }
 0x14e   :  { %v771_v56 = vpop.f32.mrb[2].mxu1  ;;  %v738_v57 = vadd.f32 %v737_v55, %v736_v54 }
 0x14f   :  { %v772_v58 = vpop.f32.mrb[3].mxu1 }
 0x150   :  { %v773_v13 = vadd.f32 %v772_v58, %v771_v56  ;;  %v448_v59 = vadd.f32 %v738_v57, %v378_v53 }
 0x152   :  { %v518_v60 = vadd.f32 %v773_v13, %v448_v59 }
 0x154   :  { %v521_v61 = vmax.f32 %v518_v60, 0.0 }
 0x156   :  { %824 = vmatmul.mubr.f32.vlgmr.msra.gmra.mrb[4].mxu0 %v521_v61 }
 0x229   :  { %v611_v63 = vpop.f32.mrb[4].mxu0 }
 0x22a   :  { %v612_v0 = vadd.f32 %v633_v62, %v611_v63  ;;  %v825_v1 = vpop.f32.mrb[5].mxu0 }
 0x22c   :  { %615 = vst [vmem:[#allocation8] sm:$0x3] %v612_v0 }
 0x22d   :  { %1067 = shalt.err (!%p1064_p0)
}
 0x22e   :  { %s1068_s11 = scalar_lea.hbm %s1200_s5, 32 }
 0x22f   :  { %p1069_p1 = scmp.ne.s32.totalorder %s1200_s5, %s1068_s11  ;;  %p1072_p2 = scmp.lt.u32.totalorder %s1068_s11, %s1200_s5 }
 0x231   :  { %p1074_p3 = pnand %p1072_p2, %p1069_p1 }
 0x233   :  { %1077 = shalt.err (!%p1074_p3)
}
 0x234   :  { %625 = dma.vmem_to_hbm [thread:$0]  %s623_s7, 32, %s1200_s5, [#allocation4]  }
 0x235   :  { %1082 = dma.done.wait [#allocation4], 32  }
 0x236   :  { %1083 = vsyncadd [#allocation4], 4294967264 }
 0x237   :  { %629 = vsyncpa [#allocation3], 1 }
 0x238   :  { %630 = vsyncpa [#allocation6], 1 }
 0x239   :  { %631 = vsyncpa [#allocation4], 1 }

// kernel: tpu_custom_call.1
= control target key start
LH: loop header
LB: loop body
LE: loop exit
PB: predicated region body
PF: predicated region fallthrough
CT: control target
= control target key end

     0   :  { %10 = vsyncpa [#allocation3], 0  ;;  %s1195_s0 = inlined_call_operand.hbm [shape: f32[2,1024], index: 0, kind: input, shape index: {}]   ;;  %s1196_s1 = inlined_call_operand.hbm [shape: f32[1024,128], index: 1, kind: input, shape index: {}]   ;;  %s1197_s2 = inlined_call_operand.vmem [shape: f32[1,128], index: 2, kind: input, shape index: {}]   ;;  %s1198_s3 = inlined_call_operand.hbm [shape: f32[128,128], index: 3, kind: input, shape index: {}]   ;;  %s1199_s4 = inlined_call_operand.vmem [shape: f32[1,128], index: 4, kind: input, shape index: {}]   ;;  %s1200_s5 = inlined_call_operand.hbm [shape: f32[2,128], index: 5, kind: output, shape index: {}]  }
   0x1   :  { %11 = vsyncpa [#allocation6], 0 }
   0x2   :  { %12 = vsyncpa [#allocation4], 0  ;;  %s1084_s18 = smov [#allocation5]   ;;  %s990_s22 = scalar_lea.hbm %s1196_s1, 16384 }
   0x3   :  { %s28_s19 = sshll.u32 %s1084_s18, 4  ;;  %p991_p0 = scmp.ne.s32.totalorder %s1196_s1, %s990_s22  ;;  %s29_s19 = int_to_ptr.vmem [resolvable:$true] %s28_s19 }
   0x4   :  { %p994_p1 = scmp.lt.u32.totalorder %s990_s22, %s1196_s1 }
   0x6   :  { %p996_p2 = pnand %p994_p1, %p991_p0 }
   0x8   :  { %999 = shalt.err (!%p996_p2)
}
   0x9   :  { %s1000_s27 = scalar_lea.vmem %s29_s19, 16384  ;;  %p1005_p4 = scmp.lt.s32.totalorder %s29_s19, %s29_s19 }
   0xa   :  { %p1001_p3 = scmp.ne.s32.totalorder %s29_s19, %s1000_s27  ;;  %p1006_p5 = scmp.lt.s32.totalorder %s1000_s27, %s1000_s27 }
   0xc   :  { %p1007_p6 = por %p1006_p5, %p1005_p4 }
   0xe   :  { %p1008_p7 = pnand %p1007_p6, %p1001_p3 }
  0x10   :  { %1011 = shalt.err (!%p1008_p7)
}
  0x11   :  { %s1085_s28 = smov 128   ;;  %s1086_s29 = smov 8  }
  0x12   :  { %34 = dma.hbm_to_vmem [thread:$0]  %s1196_s1, 16384, %s29_s19, [#allocation6], %s1085_s28, %s1085_s28, %s1086_s29  }
  0x13   :  { %s1087_s7 = smov [#allocation2]   ;;  %s1088_s9 = smov [#allocation7]  }
  0x14   :  { %s19_s8 = sshll.u32 %s1087_s7, 4  ;;  %s42_s10 = sshll.u32 %s1088_s9, 4  ;;  %s20_s8 = int_to_ptr.vmem [resolvable:$true] %s19_s8  ;;  %s43_s10 = int_to_ptr.vmem [resolvable:$true] %s42_s10 }
  0x15   :  { %s1012_s13 = scalar_lea.hbm %s1195_s0, 256 }
  0x16   :  { %p1013_p8 = scmp.ne.s32.totalorder %s1195_s0, %s1012_s13  ;;  %p1016_p9 = scmp.lt.u32.totalorder %s1012_s13, %s1195_s0 }
  0x18   :  { %p1018_p10 = pnand %p1016_p9, %p1013_p8 }
  0x1a   :  { %1021 = shalt.err (!%p1018_p10)
}
  0x1b   :  { %s1022_s1 = scalar_lea.vmem %s20_s8, 256  ;;  %p1027_p12 = scmp.lt.s32.totalorder %s20_s8, %s20_s8 }
  0x1c   :  { %p1023_p11 = scmp.ne.s32.totalorder %s20_s8, %s1022_s1  ;;  %p1028_p13 = scmp.lt.s32.totalorder %s1022_s1, %s1022_s1 }
  0x1e   :  { %p1029_p0 = por %p1028_p13, %p1027_p12 }
  0x20   :  { %p1030_p1 = pnand %p1029_p0, %p1023_p11 }
  0x22   :  { %1033 = shalt.err (!%p1030_p1)
}
  0x23   :  { %22 = dma.hbm_to_vmem [thread:$0]  %s1195_s0, 256, %s20_s8, [#allocation3]  }
  0x24   :  { %s1034_s22 = scalar_lea.hbm %s1198_s3, 2048 }
  0x25   :  { %p1035_p2 = scmp.ne.s32.totalorder %s1198_s3, %s1034_s22  ;;  %p1038_p3 = scmp.lt.u32.totalorder %s1034_s22, %s1198_s3 }
  0x27   :  { %p1040_p4 = pnand %p1038_p3, %p1035_p2 }
  0x29   :  { %1043 = shalt.err (!%p1040_p4)
}
  0x2a   :  { %s1044_s27 = scalar_lea.vmem %s43_s10, 2048  ;;  %p1049_p6 = scmp.lt.s32.totalorder %s43_s10, %s43_s10 }
  0x2b   :  { %p1045_p5 = scmp.ne.s32.totalorder %s43_s10, %s1044_s27  ;;  %p1050_p7 = scmp.lt.s32.totalorder %s1044_s27, %s1044_s27 }
  0x2d   :  { %p1051_p8 = por %p1050_p7, %p1049_p6 }
  0x2f   :  { %p1052_p9 = pnand %p1051_p8, %p1045_p5 }
  0x31   :  { %1055 = shalt.err (!%p1052_p9)
}
  0x32   :  { %48 = dma.hbm_to_vmem [thread:$0]  %s1198_s3, 2048, %s43_s10, [#allocation6], %s1085_s28, %s1085_s28, %s1086_s29  }
  0x33   :  { %1078 = dma.done.wait [#allocation3], 256  }
  0x34   :  { %1079 = vsyncadd [#allocation3], 4294967040 }
  0x35   :  { %1080 = dma.done.wait [#allocation6], 18432  }
  0x36   :  { %1081 = vsyncadd [#allocation6], 4294948864  ;;  %v78_v0 = vld [vmem:[#allocation5 + $0x80] sm:$0xff]  ;;  %v79_v1 = vld [vmem:[#allocation5 + $0x88] sm:$0xff]  ;;  %v1089_v47 = vmov 1983009808   ;;  %v203_v49 = vlaneseq }
  0x37   :  { %v62_v2 = vld [vmem:[#allocation5] sm:$0xff]  ;;  %v826_v3 = vpack.c.bf16 %v79_v1, %v78_v0  ;;  %v63_v4 = vld [vmem:[#allocation5 + $0x8] sm:$0xff]  ;;  %v80_v11 = vld [vmem:[#allocation5 + $0x90] sm:$0xff]  ;;  %v201_v48 = vunpack.c.l.s4 %v1089_v47  ;;  %vm1091_vm0 = vmmov 0  }
  0x38   :  { %v110_v5 = vld [vmem:[#allocation5 + $0x180] sm:$0xff]  ;;  %v111_v6 = vld [vmem:[#allocation5 + $0x188] sm:$0xff]  ;;  %v828_v7 = vpack.c.bf16 %v63_v4, %v62_v2  ;;  %v81_v13 = vld [vmem:[#allocation5 + $0x98] sm:$0xff]  ;;  %v204_v0 = vshrl.u32 %v203_v49, 7 }
  0x39   :  { %v858_v8 = vpack.c.bf16 %v111_v6, %v110_v5  ;;  %v94_v9 = vld [vmem:[#allocation5 + $0x100] sm:$0xff]  ;;  %v95_v10 = vld [vmem:[#allocation5 + $0x108] sm:$0xff]  ;;  %827 = vmatprep.subr.bf16.mxu0 %v826_v3  ;;  %v64_v14 = vld [vmem:[#allocation5 + $0x10] sm:$0xff]  ;;  %v830_v16 = vpack.c.bf16 %v81_v13, %v80_v11  ;;  %v202_v63 = vunpack.c.0.s8 %v201_v48 }
  0x3a   :  { %v860_v12 = vpack.c.bf16 %v95_v10, %v94_v9  ;;  %v65_v15 = vld [vmem:[#allocation5 + $0x18] sm:$0xff]  ;;  %829 = vmatpush3.bf16.msra.mxu0 %v828_v7  ;;  %v112_v18 = vld [vmem:[#allocation5 + $0x190] sm:$0xff]  ;;  %v82_v23 = vld [vmem:[#allocation5 + $0xa0] sm:$0xff] }
  0x3b   :  { %859 = vmatprep.subr.bf16.mxu1 %v858_v8  ;;  %v832_v17 = vpack.c.bf16 %v65_v15, %v64_v14  ;;  %v113_v19 = vld [vmem:[#allocation5 + $0x198] sm:$0xff]  ;;  %v96_v20 = vld [vmem:[#allocation5 + $0x110] sm:$0xff]  ;;  %v83_v24 = vld [vmem:[#allocation5 + $0xa8] sm:$0xff]  ;;  %831 = vmatprep.subr.bf16.mxu0 %v830_v16  ;;  %v1166_v13 = vsub.s32 %v202_v63, %v204_v0 }
  0x3c   :  { %861 = vmatpush3.bf16.msra.mxu1 %v860_v12  ;;  %v862_v21 = vpack.c.bf16 %v113_v19, %v112_v18  ;;  %v97_v22 = vld [vmem:[#allocation5 + $0x118] sm:$0xff]  ;;  %v834_v26 = vpack.c.bf16 %v83_v24, %v82_v23  ;;  %v66_v27 = vld [vmem:[#allocation5 + $0x20] sm:$0xff]  ;;  %v67_v28 = vld [vmem:[#allocation5 + $0x28] sm:$0xff] }
  0x3d   :  { %v864_v25 = vpack.c.bf16 %v97_v22, %v96_v20  ;;  %v114_v29 = vld [vmem:[#allocation5 + $0x1a0] sm:$0xff]  ;;  %v115_v30 = vld [vmem:[#allocation5 + $0x1a8] sm:$0xff]  ;;  %v836_v33 = vpack.c.bf16 %v67_v28, %v66_v27  ;;  %v84_v35 = vld [vmem:[#allocation5 + $0xb0] sm:$0xff] }
  0x3e   :  { %863 = vmatprep.subr.bf16.mxu1 %v862_v21  ;;  %v98_v31 = vld [vmem:[#allocation5 + $0x120] sm:$0xff]  ;;  %v99_v32 = vld [vmem:[#allocation5 + $0x128] sm:$0xff]  ;;  %833 = vmatpush3.bf16.msra.mxu0 %v832_v17  ;;  %v866_v34 = vpack.c.bf16 %v115_v30, %v114_v29  ;;  %v85_v36 = vld [vmem:[#allocation5 + $0xb8] sm:$0xff] }
  0x3f   :  { %v68_v37 = vld [vmem:[#allocation5 + $0x30] sm:$0xff]  ;;  %835 = vmatprep.subr.bf16.mxu0 %v834_v26  ;;  %v868_v38 = vpack.c.bf16 %v99_v32, %v98_v31  ;;  %v838_v39 = vpack.c.bf16 %v85_v36, %v84_v35  ;;  %v69_v40 = vld [vmem:[#allocation5 + $0x38] sm:$0xff]  ;;  %v86_v46 = vld [vmem:[#allocation5 + $0xc0] sm:$0xff] }
  0x40   :  { %865 = vmatpush3.bf16.msra.mxu1 %v864_v25  ;;  %v116_v41 = vld [vmem:[#allocation5 + $0x1b0] sm:$0xff]  ;;  %v117_v42 = vld [vmem:[#allocation5 + $0x1b8] sm:$0xff]  ;;  %v87_v50 = vld [vmem:[#allocation5 + $0xc8] sm:$0xff]  ;;  %v840_v51 = vpack.c.bf16 %v69_v40, %v68_v37 }
  0x41   :  { %867 = vmatprep.subr.bf16.mxu1 %v866_v34  ;;  %v870_v43 = vpack.c.bf16 %v117_v42, %v116_v41  ;;  %v100_v44 = vld [vmem:[#allocation5 + $0x130] sm:$0xff]  ;;  %v101_v45 = vld [vmem:[#allocation5 + $0x138] sm:$0xff]  ;;  %v118_v52 = vld [vmem:[#allocation5 + $0x1c0] sm:$0xff]  ;;  %v842_v55 = vpack.c.bf16 %v87_v50, %v86_v46 }
  0x42   :  { %837 = vmatpush3.bf16.msra.mxu0 %v836_v33  ;;  %v119_v53 = vld [vmem:[#allocation5 + $0x1c8] sm:$0xff]  ;;  %v872_v54 = vpack.c.bf16 %v101_v45, %v100_v44  ;;  %v70_v56 = vld [vmem:[#allocation5 + $0x40] sm:$0xff]  ;;  %v88_v61 = vld [vmem:[#allocation5 + $0xd0] sm:$0xff] }
  0x43   :  { %839 = vmatprep.subr.bf16.mxu0 %v838_v39  ;;  %v71_v57 = vld [vmem:[#allocation5 + $0x48] sm:$0xff]  ;;  %v102_v58 = vld [vmem:[#allocation5 + $0x140] sm:$0xff]  ;;  %v874_v59 = vpack.c.bf16 %v119_v53, %v118_v52  ;;  %v89_v62 = vld [vmem:[#allocation5 + $0xd8] sm:$0xff] }
  0x44   :  { %869 = vmatpush3.bf16.msra.mxu1 %v868_v38  ;;  %v103_v60 = vld [vmem:[#allocation5 + $0x148] sm:$0xff]  ;;  %v120_v1 = vld [vmem:[#allocation5 + $0x1d0] sm:$0xff]  ;;  %v121_v2 = vld [vmem:[#allocation5 + $0x1d8] sm:$0xff]  ;;  %v844_v3 = vpack.c.bf16 %v71_v57, %v70_v56  ;;  %v846_v5 = vpack.c.bf16 %v89_v62, %v88_v61 }
  0x45   :  { %871 = vmatprep.subr.bf16.mxu1 %v870_v43  ;;  %v876_v4 = vpack.c.bf16 %v103_v60, %v102_v58  ;;  %v72_v6 = vld [vmem:[#allocation5 + $0x50] sm:$0xff]  ;;  %v73_v7 = vld [vmem:[#allocation5 + $0x58] sm:$0xff]  ;;  %v878_v9 = vpack.c.bf16 %v121_v2, %v120_v1  ;;  %v90_v11 = vld [vmem:[#allocation5 + $0xe0] sm:$0xff] }
  0x46   :  { %841 = vmatpush3.bf16.msra.mxu0 %v840_v51  ;;  %v104_v8 = vld [vmem:[#allocation5 + $0x150] sm:$0xff]  ;;  %v105_v10 = vld [vmem:[#allocation5 + $0x158] sm:$0xff]  ;;  %v91_v12 = vld [vmem:[#allocation5 + $0xe8] sm:$0xff]  ;;  %v848_v16 = vpack.c.bf16 %v73_v7, %v72_v6 }
  0x47   :  { %843 = vmatprep.subr.bf16.mxu0 %v842_v55  ;;  %v122_v14 = vld [vmem:[#allocation5 + $0x1e0] sm:$0xff]  ;;  %v123_v15 = vld [vmem:[#allocation5 + $0x1e8] sm:$0xff]  ;;  %v880_v18 = vpack.c.bf16 %v105_v10, %v104_v8  ;;  %v850_v19 = vpack.c.bf16 %v91_v12, %v90_v11  ;;  %v60_v22 = vld [vmem:[#allocation2] sm:$0xff] }
  0x48   :  { %873 = vmatpush3.bf16.msra.mxu1 %v872_v54  ;;  %v74_v17 = vld [vmem:[#allocation5 + $0x60] sm:$0xff]  ;;  %v75_v20 = vld [vmem:[#allocation5 + $0x68] sm:$0xff]  ;;  %v882_v23 = vpack.c.bf16 %v123_v15, %v122_v14  ;;  %v92_v25 = vld [vmem:[#allocation5 + $0xf0] sm:$0xff]  ;;  %v206_v27 = vrot.slane %v60_v22, %v1166_v13  ;;  %v199_v28 = vcombine.high %v60_v22, %v60_v22 }
  0x49   :  { %875 = vmatprep.subr.bf16.mxu1 %v874_v59  ;;  %v106_v21 = vld [vmem:[#allocation5 + $0x160] sm:$0xff]  ;;  %v107_v24 = vld [vmem:[#allocation5 + $0x168] sm:$0xff]  ;;  %v93_v26 = vld [vmem:[#allocation5 + $0xf8] sm:$0xff]  ;;  %v852_v31 = vpack.c.bf16 %v75_v20, %v74_v17 }
  0x4a   :  { %845 = vmatpush3.bf16.msra.mxu0 %v844_v3  ;;  %v124_v29 = vld [vmem:[#allocation5 + $0x1f0] sm:$0xff]  ;;  %v125_v30 = vld [vmem:[#allocation5 + $0x1f8] sm:$0xff]  ;;  %v214_v32 = vcombine.high %v206_v27, %v206_v27  ;;  %v213_v33 = vrot.slane %v199_v28, %v1166_v13  ;;  %v884_v34 = vpack.c.bf16 %v107_v24, %v106_v21  ;;  %v854_v35 = vpack.c.bf16 %v93_v26, %v92_v25  ;;  %v142_v41 = vld [vmem:[#allocation5 + $0x280] sm:$0xff] }
  0x4b   :  { %847 = vmatprep.subr.bf16.mxu0 %v846_v5  ;;  %v76_v36 = vld [vmem:[#allocation5 + $0x70] sm:$0xff]  ;;  %v77_v37 = vld [vmem:[#allocation5 + $0x78] sm:$0xff]  ;;  %v886_v39 = vpack.c.bf16 %v125_v30, %v124_v29  ;;  %v143_v42 = vld [vmem:[#allocation5 + $0x288] sm:$0xff] }
  0x4c   :  { %877 = vmatpush3.bf16.msra.mxu1 %v876_v4  ;;  %v108_v38 = vld [vmem:[#allocation5 + $0x170] sm:$0xff]  ;;  %v109_v40 = vld [vmem:[#allocation5 + $0x178] sm:$0xff]  ;;  %305 = vmatprep.mubr.f32.mxu0 %v214_v32  ;;  %v215_v43 = vcombine.high %v213_v33, %v213_v33  ;;  %v174_v44 = vld [vmem:[#allocation5 + $0x380] sm:$0xff]  ;;  %v856_v46 = vpack.c.bf16 %v77_v37, %v76_v36  ;;  %v890_v48 = vpack.c.bf16 %v143_v42, %v142_v41 }
  0x4d   :  { %879 = vmatprep.subr.bf16.mxu1 %v878_v9  ;;  %v175_v45 = vld [vmem:[#allocation5 + $0x388] sm:$0xff]  ;;  %v888_v47 = vpack.c.bf16 %v109_v40, %v108_v38  ;;  %v126_v49 = vld [vmem:[#allocation5 + $0x200] sm:$0xff]  ;;  %v144_v54 = vld [vmem:[#allocation5 + $0x290] sm:$0xff] }
  0x4e   :  { %849 = vmatpush3.bf16.msra.mxu0 %v848_v16  ;;  %375 = vmatprep.mubr.f32.mxu1 %v215_v43  ;;  %v127_v50 = vld [vmem:[#allocation5 + $0x208] sm:$0xff]  ;;  %v158_v51 = vld [vmem:[#allocation5 + $0x300] sm:$0xff]  ;;  %v922_v52 = vpack.c.bf16 %v175_v45, %v174_v44  ;;  %v145_v55 = vld [vmem:[#allocation5 + $0x298] sm:$0xff] }
  0x4f   :  { %851 = vmatprep.subr.bf16.mxu0 %v850_v19  ;;  %v159_v53 = vld [vmem:[#allocation5 + $0x308] sm:$0xff]  ;;  %v176_v56 = vld [vmem:[#allocation5 + $0x390] sm:$0xff]  ;;  %v177_v57 = vld [vmem:[#allocation5 + $0x398] sm:$0xff]  ;;  %v892_v58 = vpack.c.bf16 %v127_v50, %v126_v49  ;;  %v894_v60 = vpack.c.bf16 %v145_v55, %v144_v54 }
  0x50   :  { %881 = vmatpush3.bf16.msra.mxu1 %v880_v18  ;;  %v924_v59 = vpack.c.bf16 %v159_v53, %v158_v51  ;;  %v128_v61 = vld [vmem:[#allocation5 + $0x210] sm:$0xff]  ;;  %v129_v62 = vld [vmem:[#allocation5 + $0x218] sm:$0xff]  ;;  %v926_v0 = vpack.c.bf16 %v177_v57, %v176_v56  ;;  %v146_v2 = vld [vmem:[#allocation5 + $0x2a0] sm:$0xff] }
  0x51   :  { %883 = vmatprep.subr.bf16.mxu1 %v882_v23  ;;  %v160_v63 = vld [vmem:[#allocation5 + $0x310] sm:$0xff]  ;;  %v161_v1 = vld [vmem:[#allocation5 + $0x318] sm:$0xff]  ;;  %v147_v3 = vld [vmem:[#allocation5 + $0x2a8] sm:$0xff]  ;;  %v896_v6 = vpack.c.bf16 %v129_v62, %v128_v61 }
  0x52   :  { %853 = vmatpush3.bf16.msra.mxu0 %v852_v31  ;;  %v178_v4 = vld [vmem:[#allocation5 + $0x3a0] sm:$0xff]  ;;  %v179_v5 = vld [vmem:[#allocation5 + $0x3a8] sm:$0xff]  ;;  %v928_v7 = vpack.c.bf16 %v161_v1, %v160_v63  ;;  %v898_v8 = vpack.c.bf16 %v147_v3, %v146_v2  ;;  %v148_v15 = vld [vmem:[#allocation5 + $0x2b0] sm:$0xff] }
  0x53   :  { %855 = vmatprep.subr.bf16.mxu0 %v854_v35  ;;  %v130_v9 = vld [vmem:[#allocation5 + $0x220] sm:$0xff]  ;;  %v131_v10 = vld [vmem:[#allocation5 + $0x228] sm:$0xff]  ;;  %v930_v12 = vpack.c.bf16 %v179_v5, %v178_v4  ;;  %v149_v16 = vld [vmem:[#allocation5 + $0x2b8] sm:$0xff] }
  0x54   :  { %885 = vmatpush3.bf16.msra.mxu1 %v884_v34  ;;  %v162_v11 = vld [vmem:[#allocation5 + $0x320] sm:$0xff]  ;;  %v163_v14 = vld [vmem:[#allocation5 + $0x328] sm:$0xff]  ;;  %v180_v17 = vld [vmem:[#allocation5 + $0x3b0] sm:$0xff]  ;;  %v900_v19 = vpack.c.bf16 %v131_v10, %v130_v9  ;;  %v902_v21 = vpack.c.bf16 %v149_v16, %v148_v15 }
  0x55   :  { %887 = vmatprep.subr.bf16.mxu1 %v886_v39  ;;  %v181_v18 = vld [vmem:[#allocation5 + $0x3b8] sm:$0xff]  ;;  %v932_v20 = vpack.c.bf16 %v163_v14, %v162_v11  ;;  %v132_v22 = vld [vmem:[#allocation5 + $0x230] sm:$0xff]  ;;  %v151_v28 = vld [vmem:[#allocation5 + $0x2c8] sm:$0xff] }
  0x56   :  { %857 = vmatpush3.bf16.msra.mxu0 %v856_v46  ;;  %v133_v23 = vld [vmem:[#allocation5 + $0x238] sm:$0xff]  ;;  %v164_v24 = vld [vmem:[#allocation5 + $0x330] sm:$0xff]  ;;  %v934_v25 = vpack.c.bf16 %v181_v18, %v180_v17  ;;  %v182_v29 = vld [vmem:[#allocation5 + $0x3c0] sm:$0xff] }
  0x57   :  { %891 = vmatprep.subr.bf16.mxu0 %v890_v48  ;;  %v165_v26 = vld [vmem:[#allocation5 + $0x338] sm:$0xff]  ;;  %v183_v30 = vld [vmem:[#allocation5 + $0x3c8] sm:$0xff]  ;;  %v904_v32 = vpack.c.bf16 %v133_v23, %v132_v22  ;;  %v134_v37 = vld [vmem:[#allocation5 + $0x240] sm:$0xff]  ;;  %v1090_v22 = vmov 0.0|0.0  }
  0x58   :  { %889 = vmatpush3.bf16.msra.mxu1 %v888_v47  ;;  %v61_v31 = vld [vmem:[#allocation2 + $0x8] sm:$0xff]  ;;  %v936_v35 = vpack.c.bf16 %v165_v26, %v164_v24  ;;  %v135_v38 = vld [vmem:[#allocation5 + $0x248] sm:$0xff]  ;;  %v166_v39 = vld [vmem:[#allocation5 + $0x340] sm:$0xff]  ;;  %v938_v40 = vpack.c.bf16 %v183_v30, %v182_v29 }
  0x59   :  { %923 = vmatprep.subr.bf16.mxu1 %v922_v52  ;;  %306 = vmatmul.mubr.f32.vlgmr.msra.gmra.mrb[0].mxu0 %v206_v27  ;;  %v150_v27 = vld [vmem:[#allocation5 + $0x2c0] sm:$0xff]  ;;  %v216_v34 = vcombine.high %v61_v31, %v61_v31  ;;  %v167_v41 = vld [vmem:[#allocation5 + $0x348] sm:$0xff]  ;;  %v152_v42 = vld [vmem:[#allocation5 + $0x2d0] sm:$0xff]  ;;  %v908_v48 = vpack.c.bf16 %v135_v38, %v134_v37 }
  0x5a   :  { %893 = vmatpush3.bf16.msra.mxu0 %v892_v58  ;;  %v906_v36 = vpack.c.bf16 %v151_v28, %v150_v27  ;;  %v153_v43 = vld [vmem:[#allocation5 + $0x2d8] sm:$0xff]  ;;  %v184_v46 = vld [vmem:[#allocation5 + $0x3d0] sm:$0xff]  ;;  %v940_v50 = vpack.c.bf16 %v167_v41, %v166_v39  ;;  %v154_v57 = vld [vmem:[#allocation5 + $0x2e0] sm:$0xff] }
  0x5b   :  { %376 = vmatmul.mubr.f32.vlgmr.msra.gmra.mrb[0].mxu1 %v213_v33  ;;  %895 = vmatprep.subr.bf16.mxu0 %v894_v60  ;;  %v1171_v33 = vrot.slane %v61_v31, %v1166_v13  ;;  %v230_v45 = vrot.slane %v216_v34, %v1166_v13  ;;  %v185_v47 = vld [vmem:[#allocation5 + $0x3d8] sm:$0xff]  ;;  %v910_v51 = vpack.c.bf16 %v153_v43, %v152_v42  ;;  %v136_v52 = vld [vmem:[#allocation5 + $0x250] sm:$0xff]  ;;  %v155_v58 = vld [vmem:[#allocation5 + $0x2e8] sm:$0xff] }
  0x5c   :  { %925 = vmatpush3.bf16.msra.mxu1 %v924_v59  ;;  %v137_v53 = vld [vmem:[#allocation5 + $0x258] sm:$0xff]  ;;  %v168_v54 = vld [vmem:[#allocation5 + $0x350] sm:$0xff]  ;;  %v942_v55 = vpack.c.bf16 %v185_v47, %v184_v46  ;;  %v186_v13 = vld [vmem:[#allocation5 + $0x3e0] sm:$0xff]  ;;  %v914_v62 = vpack.c.bf16 %v155_v58, %v154_v57 }
  0x5d   :  { %927 = vmatprep.subr.bf16.mxu1 %v926_v0  ;;  %v231_v44 = vcombine.high %v1171_v33, %v1171_v33  ;;  %v232_v49 = vcombine.high %v230_v45, %v230_v45  ;;  %v169_v56 = vld [vmem:[#allocation5 + $0x358] sm:$0xff]  ;;  %v187_v59 = vld [vmem:[#allocation5 + $0x3e8] sm:$0xff]  ;;  %v912_v60 = vpack.c.bf16 %v137_v53, %v136_v52  ;;  %v138_v63 = vld [vmem:[#allocation5 + $0x260] sm:$0xff] }
  0x5e   :  { %897 = vmatpush3.bf16.msra.mxu0 %v896_v6  ;;  %v944_v61 = vpack.c.bf16 %v169_v56, %v168_v54  ;;  %v139_v0 = vld [vmem:[#allocation5 + $0x268] sm:$0xff]  ;;  %v170_v1 = vld [vmem:[#allocation5 + $0x360] sm:$0xff]  ;;  %v946_v2 = vpack.c.bf16 %v187_v59, %v186_v13  ;;  %v156_v4 = vld [vmem:[#allocation5 + $0x2f0] sm:$0xff] }
  0x5f   :  { %899 = vmatprep.subr.bf16.mxu0 %v898_v8  ;;  %445 = vmatprep.mubr.f32.mxu0 %v231_v44  ;;  %v171_v3 = vld [vmem:[#allocation5 + $0x368] sm:$0xff]  ;;  %v157_v5 = vld [vmem:[#allocation5 + $0x2f8] sm:$0xff]  ;;  %v188_v6 = vld [vmem:[#allocation5 + $0x3f0] sm:$0xff]  ;;  %v916_v8 = vpack.c.bf16 %v139_v0, %v138_v63  ;;  %v1092_v44 = vmov 0.0  }
  0x60   :  { %929 = vmatpush3.bf16.msra.mxu1 %v928_v7  ;;  %515 = vmatprep.mubr.f32.mxu1 %v232_v49  ;;  %v189_v7 = vld [vmem:[#allocation5 + $0x3f8] sm:$0xff]  ;;  %v948_v9 = vpack.c.bf16 %v171_v3, %v170_v1  ;;  %v918_v10 = vpack.c.bf16 %v157_v5, %v156_v4  ;;  %v140_v11 = vld [vmem:[#allocation5 + $0x270] sm:$0xff]  ;;  %v526_v26 = vld [vmem:[#allocation7 + $0x20] sm:$0xff] }
  0x61   :  { %931 = vmatprep.subr.bf16.mxu1 %v930_v12  ;;  %v141_v12 = vld [vmem:[#allocation5 + $0x278] sm:$0xff]  ;;  %v950_v14 = vpack.c.bf16 %v189_v7, %v188_v6  ;;  %v172_v15 = vld [vmem:[#allocation5 + $0x370] sm:$0xff]  ;;  %v527_v27 = vld [vmem:[#allocation7 + $0x28] sm:$0xff] }
  0x62   :  { %901 = vmatpush3.bf16.msra.mxu0 %v900_v19  ;;  %v173_v16 = vld [vmem:[#allocation5 + $0x378] sm:$0xff]  ;;  %v920_v17 = vpack.c.bf16 %v141_v12, %v140_v11  ;;  %v522_v19 = vld [vmem:[#allocation7] sm:$0xff]  ;;  %v961_v28 = vpack.c.bf16 %v527_v27, %v526_v26  ;;  %v528_v29 = vld [vmem:[#allocation7 + $0x30] sm:$0xff] }
  0x63   :  { %903 = vmatprep.subr.bf16.mxu0 %v902_v21  ;;  %v952_v18 = vpack.c.bf16 %v173_v16, %v172_v15  ;;  %v524_v21 = vld [vmem:[#allocation7 + $0x10] sm:$0xff]  ;;  %v525_v24 = vld [vmem:[#allocation7 + $0x18] sm:$0xff]  ;;  %v534_v38 = vld [vmem:[#allocation7 + $0x60] sm:$0xff] }
  0x64   :  { %933 = vmatpush3.bf16.msra.mxu1 %v932_v20  ;;  %v523_v20 = vld [vmem:[#allocation7 + $0x8] sm:$0xff]  ;;  %v529_v30 = vld [vmem:[#allocation7 + $0x38] sm:$0xff]  ;;  %v536_v41 = vld [vmem:[#allocation7 + $0x70] sm:$0xff] }
  0x65   :  { %935 = vmatprep.subr.bf16.mxu1 %v934_v25  ;;  %v955_v23 = vpack.c.bf16 %v523_v20, %v522_v19  ;;  %v958_v25 = vpack.c.bf16 %v525_v24, %v524_v21  ;;  %v964_v31 = vpack.c.bf16 %v529_v30, %v528_v29  ;;  %v535_v39 = vld [vmem:[#allocation7 + $0x68] sm:$0xff]  ;;  %v537_v42 = vld [vmem:[#allocation7 + $0x78] sm:$0xff]  ;;  %v632_v46 = vld [vmem:[%s1197_s2] ss:$0 sm:$0xff]  ;;  %s1093_s2 = smov [#allocation8]  }
  0x66   :  { %905 = vmatpush3.bf16.msra.mxu0 %v904_v32  ;;  %v530_v32 = vld [vmem:[#allocation7 + $0x40] sm:$0xff]  ;;  %v976_v43 = vpack.c.bf16 %v537_v42, %v536_v41  ;;  %s622_s7 = sshll.u32 %s1093_s2, 4  ;;  %s623_s7 = int_to_ptr.vmem [resolvable:$true] %s622_s7 }
  0x67   :  { %907 = vmatprep.subr.bf16.mxu0 %v906_v36  ;;  %v533_v36 = vld [vmem:[#allocation7 + $0x58] sm:$0xff]  ;;  %s1056_s8 = scalar_lea.vmem %s623_s7, 32  ;;  %p1061_p11 = scmp.lt.s32.totalorder %s623_s7, %s623_s7 }
  0x68   :  { %937 = vmatpush3.bf16.msra.mxu1 %v936_v35  ;;  %v532_v35 = vld [vmem:[#allocation7 + $0x50] sm:$0xff]  ;;  %p1057_p10 = scmp.ne.s32.totalorder %s623_s7, %s1056_s8  ;;  %p1062_p12 = scmp.lt.s32.totalorder %s1056_s8, %s1056_s8 }
  0x69   :  { %939 = vmatprep.subr.bf16.mxu1 %v938_v40  ;;  %v970_v37 = vpack.c.bf16 %v533_v36, %v532_v35  ;;  %v973_v40 = vpack.c.bf16 %v535_v39, %v534_v38 }
  0x6a   :  { %909 = vmatpush3.bf16.msra.mxu0 %v908_v48  ;;  %p1063_p13 = por %p1062_p12, %p1061_p11 }
  0x6b   :  { %911 = vmatprep.subr.bf16.mxu0 %v910_v51 }
  0x6c   :  { %941 = vmatpush3.bf16.msra.mxu1 %v940_v50  ;;  %p1064_p0 = pnand %p1063_p13, %p1057_p10 }
  0x6d   :  { %943 = vmatprep.subr.bf16.mxu1 %v942_v55 }
  0x6e   :  { %913 = vmatpush3.bf16.msra.mxu0 %v912_v60 }
  0x6f   :  { %915 = vmatprep.subr.bf16.mxu0 %v914_v62  ;;  %v633_v62 = vld [vmem:[%s1199_s4] ss:$0 sm:$0xff] }
  0x70   :  { %945 = vmatpush3.bf16.msra.mxu1 %v944_v61 }
  0x71   :  { %947 = vmatprep.subr.bf16.mxu1 %v946_v2 }
  0x72   :  { %917 = vmatpush3.bf16.msra.mxu0 %v916_v8 }
  0x73   :  { %919 = vmatprep.subr.bf16.mxu0 %v918_v10 }
  0x74   :  { %949 = vmatpush3.bf16.msra.mxu1 %v948_v9 }
  0x75   :  { %951 = vmatprep.subr.bf16.mxu1 %v950_v14 }
  0x76   :  { %921 = vmatpush3.bf16.msra.mxu0 %v920_v17 }
  0x77   :  { %954 = vmatprep.subr.bf16.mxu0 %v1090_v22 }
  0x78   :  { %953 = vmatpush3.bf16.msra.mxu1 %v952_v18 }
  0x79   :  { %446 = vmatmul.mubr.f32.vlgmr.msra.gmra.mrb[2].mxu0 %v1171_v33  ;;  %v531_v33 = vld [vmem:[#allocation7 + $0x48] sm:$0xff] }
  0x7a   :  { %956 = vmatpush3.bf16.msra.mxu0 %v955_v23  ;;  %v967_v34 = vpack.c.bf16 %v531_v33, %v530_v32  ;;  %823 = vmatprep.mubr.msk.f32.mxu0 %vm1091_vm0, %v1092_v44 }
  0x7b   :  { %516 = vmatmul.mubr.f32.vlgmr.msra.gmra.mrb[2].mxu1 %v230_v45  ;;  %957 = vmatprep.subr.bf16.mxu0 %v1090_v22 }
  0x7e   :  { %959 = vmatpush3.bf16.msra.mxu0 %v958_v25 }
  0x7f   :  { %960 = vmatprep.subr.bf16.mxu0 %v1090_v22 }
  0x82   :  { %962 = vmatpush3.bf16.msra.mxu0 %v961_v28 }
  0x83   :  { %963 = vmatprep.subr.bf16.mxu0 %v1090_v22 }
  0x86   :  { %965 = vmatpush3.bf16.msra.mxu0 %v964_v31 }
  0x87   :  { %966 = vmatprep.subr.bf16.mxu0 %v1090_v22 }
  0x8a   :  { %968 = vmatpush3.bf16.msra.mxu0 %v967_v34 }
  0x8b   :  { %969 = vmatprep.subr.bf16.mxu0 %v1090_v22 }
  0x8e   :  { %971 = vmatpush3.bf16.msra.mxu0 %v970_v37 }
  0x8f   :  { %972 = vmatprep.subr.bf16.mxu0 %v1090_v22 }
  0x92   :  { %974 = vmatpush3.bf16.msra.mxu0 %v973_v40 }
  0x93   :  { %975 = vmatprep.subr.bf16.mxu0 %v1090_v22 }
  0x96   :  { %977 = vmatpush3.bf16.msra.mxu0 %v976_v43 }
 0x12c   :  { %v666_v45 = vpop.f32.mrb[0].mxu0 }
 0x12d   :  { %v667_v47 = vpop.f32.mrb[1].mxu0 }
 0x12e   :  { %v701_v48 = vpop.f32.mrb[0].mxu1  ;;  %v668_v49 = vadd.f32 %v667_v47, %v666_v45 }
 0x12f   :  { %v702_v50 = vpop.f32.mrb[1].mxu1 }
 0x130   :  { %v703_v51 = vadd.f32 %v702_v50, %v701_v48  ;;  %v308_v52 = vadd.f32 %v668_v49, %v632_v46 }
 0x132   :  { %v378_v53 = vadd.f32 %v703_v51, %v308_v52 }
 0x14c   :  { %v736_v54 = vpop.f32.mrb[2].mxu0 }
 0x14d   :  { %v737_v55 = vpop.f32.mrb[3].mxu0 }
 0x14e   :  { %v771_v56 = vpop.f32.mrb[2].mxu1  ;;  %v738_v57 = vadd.f32 %v737_v55, %v736_v54 }
 0x14f   :  { %v772_v58 = vpop.f32.mrb[3].mxu1 }
 0x150   :  { %v773_v13 = vadd.f32 %v772_v58, %v771_v56  ;;  %v448_v59 = vadd.f32 %v738_v57, %v378_v53 }
 0x152   :  { %v518_v60 = vadd.f32 %v773_v13, %v448_v59 }
 0x154   :  { %v521_v61 = vmax.f32 %v518_v60, 0.0 }
 0x156   :  { %824 = vmatmul.mubr.f32.vlgmr.msra.gmra.mrb[4].mxu0 %v521_v61 }
 0x229   :  { %v611_v63 = vpop.f32.mrb[4].mxu0 }
 0x22a   :  { %v612_v0 = vadd.f32 %v633_v62, %v611_v63  ;;  %v825_v1 = vpop.f32.mrb[5].mxu0 }
 0x22c   :  { %615 = vst [vmem:[#allocation8] sm:$0x3] %v612_v0 }
 0x22d   :  { %1067 = shalt.err (!%p1064_p0)
}
 0x22e   :  { %s1068_s11 = scalar_lea.hbm %s1200_s5, 32 }
 0x22f   :  { %p1069_p1 = scmp.ne.s32.totalorder %s1200_s5, %s1068_s11  ;;  %p1072_p2 = scmp.lt.u32.totalorder %s1068_s11, %s1200_s5 }
 0x231   :  { %p1074_p3 = pnand %p1072_p2, %p1069_p1 }
 0x233   :  { %1077 = shalt.err (!%p1074_p3)
}
 0x234   :  { %625 = dma.vmem_to_hbm [thread:$0]  %s623_s7, 32, %s1200_s5, [#allocation4]  }
 0x235   :  { %1082 = dma.done.wait [#allocation4], 32  }
 0x236   :  { %1083 = vsyncadd [#allocation4], 4294967264 }
 0x237   :  { %629 = vsyncpa [#allocation3], 1 }
 0x238   :  { %630 = vsyncpa [#allocation6], 1 }
 0x239   :  { %631 = vsyncpa [#allocation4], 1 }

</bundles_post_ra>
